<compile_context>
chip_gen: v6e
topology: v6e:2x2x1
jax: 0.10.0
libtpu: 0.0.40
codegen_flags: <defaults>
</compile_context>

<pallas_src>
import jax
import jax.numpy as jnp
import numpy as np
from jax.experimental import pallas as pl
from jax.experimental.pallas import tpu as pltpu


# ----------------------------------------------------------------------------
# Pallas kernel: batch-blocked, K-streamed MLP head
#     out = ReLU(x @ W1 + b1) @ W2 + b2
# Grid = (num_batch_blocks, num_k_blocks); reduction (K) axis last, "arbitrary".
# ----------------------------------------------------------------------------
def _head_mlp_kernel(x_ref, w1_ref, b1_ref, w2_ref, b2_ref, o_ref, acc_ref):
    # x_ref : (TN, KT)   bf16   | w1_ref: (KT, MID) bf16 (streamed over k)
    # b1_ref: (1, MID)   f32    | w2_ref: (MID, TOT) bf16 (resident)
    # b2_ref: (1, TOT)   f32    | o_ref : (TN, TOT) f32
    # acc_ref: (TN, MID) f32 VMEM scratch accumulator
    k = pl.program_id(1)

    @pl.when(k == 0)
    def _():
        acc_ref[...] = jnp.zeros_like(acc_ref)

    # (TN, KT) x (KT, MID) -> f32 accumulate on the MXU (M = TN rows).
    acc_ref[...] += jnp.dot(x_ref[...], w1_ref[...],
                            preferred_element_type=jnp.float32)

    @pl.when(k == pl.num_programs(1) - 1)
    def _():
        h = jnp.maximum(acc_ref[...] + b1_ref[...], 0.0)           # f32 bias + ReLU
        h = h.astype(jnp.bfloat16)                                  # bf16 into the MXU
        out = jnp.dot(h, w2_ref[...],
                      preferred_element_type=jnp.float32) + b2_ref[...]
        o_ref[...] = out.astype(o_ref.dtype)                        # lane-dense (TOT % 128 == 0)


def head_mlp(x, w1t, b1, w2t, b2, *, tile_n, tile_k,
             vmem_limit_bytes=48 * 1024 * 1024):
    """x: (N_pad, ID_pad) bf16 (zero padded). Returns (N_pad, TOT) f32."""
    n_pad, id_pad = x.shape
    mid = w1t.shape[1]
    tot = w2t.shape[1]
    assert n_pad % tile_n == 0 and id_pad % tile_k == 0
    grid = (n_pad // tile_n, id_pad // tile_k)

    flops = 2 * n_pad * id_pad * mid + 2 * n_pad * mid * tot
    bytes_accessed = (x.size * 2 + grid[0] * w1t.size * 2 + w2t.size * 2
                      + b1.size * 4 + b2.size * 4 + n_pad * tot * 4)

    return pl.pallas_call(
        _head_mlp_kernel,
        out_shape=jax.ShapeDtypeStruct((n_pad, tot), jnp.float32),
        grid_spec=pltpu.PrefetchScalarGridSpec(
            num_scalar_prefetch=0,
            grid=grid,
            in_specs=[
                pl.BlockSpec((tile_n, tile_k), lambda b, k: (b, k)),   # activations
                pl.BlockSpec((tile_k, mid), lambda b, k: (k, 0)),      # W1 tile, streamed over k
                pl.BlockSpec((1, mid), lambda b, k: (0, 0)),           # b1  (VMEM-resident)
                pl.BlockSpec((mid, tot), lambda b, k: (0, 0)),         # W2  (VMEM-resident)
                pl.BlockSpec((1, tot), lambda b, k: (0, 0)),           # b2  (VMEM-resident)
            ],
            out_specs=pl.BlockSpec((tile_n, tot), lambda b, k: (b, 0)),
            scratch_shapes=[pltpu.VMEM((tile_n, mid), jnp.float32)],
        ),
        compiler_params=pltpu.CompilerParams(
            dimension_semantics=("parallel", "arbitrary"),
            vmem_limit_bytes=vmem_limit_bytes,
        ),
        cost_estimate=pl.CostEstimate(flops=int(flops), transcendentals=0,
                                      bytes_accessed=int(bytes_accessed)),
    )(x, w1t, b1, w2t, b2)


# ----------------------------------------------------------------------------
# parsingNet in JAX (head MLP in Pallas; backbone stub / 1x1 pool / glue in XLA)
# ----------------------------------------------------------------------------
class ParsingNetPallas:
    def __init__(self, key, *, backbone='18',
                 num_grid_row=4, num_cls_row=8, num_grid_col=4, num_cls_col=8,
                 num_lane_on_row=4, num_lane_on_col=4,
                 input_height=160, input_width=160, fc_norm=False,
                 tile_n=32, tile_k=512):
        assert not fc_norm, "fc_norm=False path (Identity) implemented"
        assert tile_n % 8 == 0, "batch tile must be a multiple of 8 (sublane tiling)"
        assert tile_k % 128 == 0, "K tile must be a multiple of 128 (lane tiling)"
        self.num_grid_row, self.num_cls_row = num_grid_row, num_cls_row
        self.num_grid_col, self.num_cls_col = num_grid_col, num_cls_col
        self.num_lane_on_row, self.num_lane_on_col = num_lane_on_row, num_lane_on_col
        self.dim1 = num_grid_row * num_cls_row * num_lane_on_row
        self.dim2 = num_grid_col * num_cls_col * num_lane_on_col
        self.dim3 = 2 * num_cls_row * num_lane_on_row
        self.dim4 = 2 * num_cls_col * num_lane_on_col
        self.total_dim = self.dim1 + self.dim2 + self.dim3 + self.dim4
        self.mid_dim = 2048
        self.spatial = (input_height // 32) * (input_width // 32)
        self.input_dim = self.spatial * 8
        self.fea_channels = 512 if backbone in ['34', '18', '34fca'] else 2048
        self.tile_n = tile_n
        self.tile_k = tile_k
        # pad input_dim up to a multiple of the K tile (lane-dense, MXU-aligned K)
        self.id_pad = ((self.input_dim + tile_k - 1) // tile_k) * tile_k

        ks = jax.random.split(key, 8)
        s = 0.02
        # backbone stub projection (3 -> fea_channels), 1x1
        self.w_bb = jax.random.normal(ks[0], (self.fea_channels, 3), jnp.float32) * s
        self.b_bb = jax.random.normal(ks[1], (self.fea_channels,), jnp.float32) * s
        # pool 1x1 conv (computed in XLA, full f32 like PyTorch)
        self.wp = jax.random.normal(ks[2], (8, self.fea_channels), jnp.float32) * s
        self.b_pool = jax.random.normal(ks[3], (8,), jnp.float32) * s
        # PyTorch-layout master FC params
        w1 = jax.random.normal(ks[4], (self.mid_dim, self.input_dim), jnp.float32) * s
        b1 = jax.random.normal(ks[5], (self.mid_dim,), jnp.float32) * s
        w2 = jax.random.normal(ks[6], (self.total_dim, self.mid_dim), jnp.float32) * s
        b2 = jax.random.normal(ks[7], (self.total_dim,), jnp.float32) * s

        # ---- init-time weight prep: layout + dtype + padding, nothing left per-call ----
        # W1 transposed to (input_dim, MID), zero-padded rows to id_pad, bf16 for the MXU.
        self.w1t = jnp.pad(w1.T, ((0, self.id_pad - self.input_dim), (0, 0))
                           ).astype(jnp.bfloat16)                                  # (ID_pad, MID)
        self.b1 = b1.reshape(1, self.mid_dim).astype(jnp.float32)                  # (1, MID)
        self.w2t = w2.T.astype(jnp.bfloat16)                                       # (MID, TOT)
        self.b2 = b2.reshape(1, self.total_dim).astype(jnp.float32)                # (1, TOT)

    def _backbone_stub(self, x):
        # TODO(synk): the real `resnet` backbone is an external module not defined in the
        # provided source; stubbed by a deterministic 32x avg-pool + 1x1 channel projection
        # producing `fea` with the correct shape/channels.
        N, C, H, W = x.shape
        xp = x.reshape(N, C, H // 32, 32, W // 32, 32).mean(axis=(3, 5))   # (N, 3, Hs, Ws)
        return jnp.einsum('nchw,oc->nohw', xp, self.w_bb) + self.b_bb[None, :, None, None]

    def _pooled_flat(self, x):
        """1x1 pool conv (XLA) + PyTorch-order CHW flatten: (N, input_dim) f32."""
        fea = self._backbone_stub(x)                                        # (N, Cfea, Hs, Ws)
        pooled = (jnp.einsum('nchw,oc->nohw', fea, self.wp)
                  + self.b_pool[None, :, None, None])                       # (N, 8, Hs, Ws)
        return pooled.reshape(x.shape[0], self.input_dim)                   # == .view(-1, input_dim)

    def forward(self, x):
        flat = self._pooled_flat(x)                                         # (N, ID) f32
        n = flat.shape[0]
        n_pad = ((n + self.tile_n - 1) // self.tile_n) * self.tile_n
        # bf16 activations into the kernel (halves activation DMA); zero-pad batch & K.
        xk = jnp.pad(flat.astype(jnp.bfloat16),
                     ((0, n_pad - n), (0, self.id_pad - self.input_dim)))
        out = head_mlp(xk, self.w1t, self.b1, self.w2t, self.b2,
                       tile_n=self.tile_n, tile_k=self.tile_k)[:n]          # (N, TOT) [Pallas]
        d1, d2, d3, d4 = self.dim1, self.dim2, self.dim3, self.dim4
        return {
            'loc_row': out[:, :d1].reshape(-1, self.num_grid_row, self.num_cls_row,
                                           self.num_lane_on_row),
            'loc_col': out[:, d1:d1 + d2].reshape(-1, self.num_grid_col, self.num_cls_col,
                                                  self.num_lane_on_col),
            'exist_row': out[:, d1 + d2:d1 + d2 + d3].reshape(-1, 2, self.num_cls_row,
                                                              self.num_lane_on_row),
            'exist_col': out[:, -d4:].reshape(-1, 2, self.num_cls_col,
                                              self.num_lane_on_col),
        }

    # pure-JAX reference mirroring the kernel's numerics (same bf16 weight/activation casts)
    def forward_ref(self, x):
        flat = self._pooled_flat(x)
        xq = flat.astype(jnp.bfloat16).astype(jnp.float32)
        w1f = self.w1t[:self.input_dim].astype(jnp.float32)
        h = xq @ w1f + self.b1
        h = jnp.maximum(h, 0.0).astype(jnp.bfloat16).astype(jnp.float32)
        return h @ self.w2t.astype(jnp.float32) + self.b2


if __name__ == "__main__":
    key = jax.random.PRNGKey(0)
    k_param, k_in = jax.random.split(key)

    # Toy sizes: 160x160 input -> spatial S=25 -> input_dim=200, padded to 256 => 2 K tiles
    # of 128 (exercises the accumulator / K-streaming path).  Batch 16 with tile_n=8 =>
    # 2 batch blocks (exercises the "parallel" batch axis / both v7x TensorCores).
    net = ParsingNetPallas(k_param, backbone='18', input_height=160, input_width=160,
                           tile_n=8, tile_k=128)

    x = jax.random.normal(k_in, (16, 3, 160, 160), jnp.float32)   # NCHW, like PyTorch

    pred = jax.jit(net.forward)(x)
    jax.block_until_ready(pred)

    # sanity: shapes + numerics vs plain-JAX reference (same bf16 weight storage / casts)
    assert pred['loc_row'].shape == (16, 4, 8, 4)
    assert pred['loc_col'].shape == (16, 4, 8, 4)
    assert pred['exist_row'].shape == (16, 2, 8, 4)
    assert pred['exist_col'].shape == (16, 2, 8, 4)

    ref = net.forward_ref(x)
    got = jnp.concatenate([pred['loc_row'].reshape(16, -1),
                           pred['loc_col'].reshape(16, -1),
                           pred['exist_row'].reshape(16, -1),
                           pred['exist_col'].reshape(16, -1)], axis=1)
    np.testing.assert_allclose(np.asarray(got), np.asarray(ref), rtol=2e-2, atol=5e-4)

    print("KERNEL_OK")
</pallas_src>

<mosaic_0001>
module attributes {stable_mosaic.version = 11 : i64} {
  func.func @_head_mlp_kernel(%arg0: i32, %arg1: i32, %arg2: memref<8x128xbf16, #tpu.memory_space<vmem>>, %arg3: memref<128x2048xbf16, #tpu.memory_space<vmem>>, %arg4: memref<1x2048xf32, #tpu.memory_space<vmem>>, %arg5: memref<2048x384xbf16, #tpu.memory_space<vmem>>, %arg6: memref<1x384xf32, #tpu.memory_space<vmem>>, %arg7: memref<8x384xf32, #tpu.memory_space<vmem>>, %arg8: memref<8x2048xf32, #tpu.memory_space<vmem>>) attributes {dimension_semantics = [#tpu.dimension_semantics<parallel>, #tpu.dimension_semantics<arbitrary>], iteration_bounds = array<i64: 2, 2>, scalar_prefetch = 0 : i64, scratch_operands = 1 : i64, tpu.core_type = #tpu.core_type<tc>, window_params = [{transform_indices = @transform_0, window_bounds = array<i64: 8, 128>}, {transform_indices = @transform_1, window_bounds = array<i64: 128, 2048>}, {pipeline_mode = #tpu.pipeline_mode<synchronous>, transform_indices = @transform_2, window_bounds = array<i64: 1, 2048>}, {pipeline_mode = #tpu.pipeline_mode<synchronous>, transform_indices = @transform_3, window_bounds = array<i64: 2048, 384>}, {pipeline_mode = #tpu.pipeline_mode<synchronous>, transform_indices = @transform_4, window_bounds = array<i64: 1, 384>}, {transform_indices = @transform_5, window_bounds = array<i64: 8, 384>}]} {
    %c0_i32 = arith.constant 0 : i32
    %0 = arith.cmpi eq, %arg1, %c0_i32 : i32
    %1 = arith.extui %0 : i1 to i32
    %c0_i32_0 = arith.constant 0 : i32
    %2 = arith.cmpi ne, %1, %c0_i32_0 : i32
    scf.if %2 {
      %cst_9 = arith.constant 0.000000e+00 : f32
      %12 = vector.broadcast %cst_9 : f32 to vector<8x2048xf32>
      %c0_10 = arith.constant 0 : index
      %c0_11 = arith.constant 0 : index
      %13 = vector.load %arg8[%c0_10, %c0_11] : memref<8x2048xf32, #tpu.memory_space<vmem>>, vector<8x2048xf32>
      tpu.vector_store %arg8[%c0_10, %c0_11], %12 {strides = array<i32>} : memref<8x2048xf32, #tpu.memory_space<vmem>>, vector<8x2048xf32>,
    } else {
    }
    %c0 = arith.constant 0 : index
    %c0_1 = arith.constant 0 : index
    %3 = vector.load %arg8[%c0, %c0_1] : memref<8x2048xf32, #tpu.memory_space<vmem>>, vector<8x2048xf32>
    %c0_2 = arith.constant 0 : index
    %c0_3 = arith.constant 0 : index
    %4 = vector.load %arg2[%c0_2, %c0_3] : memref<8x128xbf16, #tpu.memory_space<vmem>>, vector<8x128xbf16>
    %c0_4 = arith.constant 0 : index
    %c0_5 = arith.constant 0 : index
    %5 = vector.load %arg3[%c0_4, %c0_5] : memref<128x2048xbf16, #tpu.memory_space<vmem>>, vector<128x2048xbf16>
    %cst = arith.constant dense<0.000000e+00> : vector<8x2048xf32>
    %6 = tpu.matmul %4, %5, %cst {dimension_numbers = #tpu.dot_dimension_numbers<[1], [0], [0], [1], [0, 0, 1, 1], [], []>} : vector<8x128xbf16>, vector<128x2048xbf16>, vector<8x2048xf32> -> vector<8x2048xf32>
    %7 = arith.addf %3, %6 : vector<8x2048xf32>
    %c0_6 = arith.constant 0 : index
    %c0_7 = arith.constant 0 : index
    %8 = vector.load %arg8[%c0_6, %c0_7] : memref<8x2048xf32, #tpu.memory_space<vmem>>, vector<8x2048xf32>
    tpu.vector_store %arg8[%c0_6, %c0_7], %7 {strides = array<i32>} : memref<8x2048xf32, #tpu.memory_space<vmem>>, vector<8x2048xf32>,
    %c1_i32 = arith.constant 1 : i32
    %9 = arith.cmpi eq, %arg1, %c1_i32 : i32
    %10 = arith.extui %9 : i1 to i32
    %c0_i32_8 = arith.constant 0 : i32
    %11 = arith.cmpi ne, %10, %c0_i32_8 : i32
    scf.if %11 {
      %c0_9 = arith.constant 0 : index
      %c0_10 = arith.constant 0 : index
      %12 = vector.load %arg8[%c0_9, %c0_10] : memref<8x2048xf32, #tpu.memory_space<vmem>>, vector<8x2048xf32>
      %c0_11 = arith.constant 0 : index
      %c0_12 = arith.constant 0 : index
      %13 = vector.load %arg4[%c0_11, %c0_12] : memref<1x2048xf32, #tpu.memory_space<vmem>>, vector<1x2048xf32>
      %14 = vector.broadcast %13 : vector<1x2048xf32> to vector<8x2048xf32>
      %15 = arith.addf %12, %14 : vector<8x2048xf32>
      %cst_13 = arith.constant 0.000000e+00 : f32
      %16 = vector.broadcast %cst_13 : f32 to vector<8x2048xf32>
      %17 = arith.maximumf %15, %16 : vector<8x2048xf32>
      %18 = arith.truncf %17 : vector<8x2048xf32> to vector<8x2048xbf16>
      %c0_14 = arith.constant 0 : index
      %c0_15 = arith.constant 0 : index
      %19 = vector.load %arg5[%c0_14, %c0_15] : memref<2048x384xbf16, #tpu.memory_space<vmem>>, vector<2048x384xbf16>
      %cst_16 = arith.constant dense<0.000000e+00> : vector<8x384xf32>
      %20 = tpu.matmul %18, %19, %cst_16 {dimension_numbers = #tpu.dot_dimension_numbers<[1], [0], [0], [1], [0, 0, 1, 1], [], []>} : vector<8x2048xbf16>, vector<2048x384xbf16>, vector<8x384xf32> -> vector<8x384xf32>
      %c0_17 = arith.constant 0 : index
      %c0_18 = arith.constant 0 : index
      %21 = vector.load %arg6[%c0_17, %c0_18] : memref<1x384xf32, #tpu.memory_space<vmem>>, vector<1x384xf32>
      %22 = vector.broadcast %21 : vector<1x384xf32> to vector<8x384xf32>
      %23 = arith.addf %20, %22 : vector<8x384xf32>
      %c0_19 = arith.constant 0 : index
      %c0_20 = arith.constant 0 : index
      %24 = vector.load %arg7[%c0_19, %c0_20] : memref<8x384xf32, #tpu.memory_space<vmem>>, vector<8x384xf32>
      tpu.vector_store %arg7[%c0_19, %c0_20], %23 {strides = array<i32>} : memref<8x384xf32, #tpu.memory_space<vmem>>, vector<8x384xf32>,
    } else {
    }
    return
  }
  func.func @transform_0(%arg0: i32, %arg1: i32) -> (i32, i32) {
    %c0_i32 = arith.constant 0 : i32
    return %arg0, %arg1 : i32, i32
  }
  func.func @transform_1(%arg0: i32, %arg1: i32) -> (i32, i32) {
    %c0_i32 = arith.constant 0 : i32
    %c0_i32_0 = arith.constant 0 : i32
    return %arg1, %c0_i32 : i32, i32
  }
  func.func @transform_2(%arg0: i32, %arg1: i32) -> (i32, i32) {
    %c0_i32 = arith.constant 0 : i32
    %c0_i32_0 = arith.constant 0 : i32
    %c0_i32_1 = arith.constant 0 : i32
    return %c0_i32, %c0_i32_0 : i32, i32
  }
  func.func @transform_3(%arg0: i32, %arg1: i32) -> (i32, i32) {
    %c0_i32 = arith.constant 0 : i32
    %c0_i32_0 = arith.constant 0 : i32
    %c0_i32_1 = arith.constant 0 : i32
    return %c0_i32, %c0_i32_0 : i32, i32
  }
  func.func @transform_4(%arg0: i32, %arg1: i32) -> (i32, i32) {
    %c0_i32 = arith.constant 0 : i32
    %c0_i32_0 = arith.constant 0 : i32
    %c0_i32_1 = arith.constant 0 : i32
    return %c0_i32, %c0_i32_0 : i32, i32
  }
  func.func @transform_5(%arg0: i32, %arg1: i32) -> (i32, i32) {
    %c0_i32 = arith.constant 0 : i32
    %c0_i32_0 = arith.constant 0 : i32
    return %arg0, %c0_i32 : i32, i32
  }
}

</mosaic_0001>

<bundles_post_ra>
// kernel: forward.1
= control target key start
LH: loop header
LB: loop body
LE: loop exit
PB: predicated region body
PF: predicated region fallthrough
CT: control target
= control target key end

     0   :  { %s6234_s18 = smov 0   ;;  %s6236_s19 = smov 0   ;;  %s7758_s0 = inlined_call_operand.vmem [shape: bf16[16,256], index: 0, kind: input, shape index: {}]   ;;  %s7759_s1 = inlined_call_operand.vmem [shape: bf16[256,2048], index: 1, kind: input, shape index: {}]   ;;  %s7760_s2 = inlined_call_operand.vmem [shape: f32[1,2048], index: 2, kind: input, shape index: {}]   ;;  %s7761_s3 = inlined_call_operand.vmem [shape: bf16[2048,384], index: 3, kind: input, shape index: {}]   ;;  %s7762_s4 = inlined_call_operand.vmem [shape: f32[1,384], index: 4, kind: input, shape index: {}]   ;;  %s7763_s5 = inlined_call_operand.vmem [shape: f32[16,384], index: 5, kind: output, shape index: {}]  }
   0x1   :  { %s6238_s20 = smov 0   ;;  %s6240_s21 = smov 0  }
   0x2   :  { %s6242_s22 = smov 0  }
   0x3 LB: > { %s24_s23 = sadd.s32 1, %s6192_s20  ;;  %s27_s24 = sadd.s32 1, %s6196_s21  ;;  %s6200_s22 = sphi %s6242_s22, %s15_s22   ;;  %s6196_s21 = sphi %s6240_s21, %s7767_s21   ;;  %s6192_s20 = sphi %s6238_s20, %s7766_s20   ;;  %s6188_s19 = sphi %s6236_s19, %s7765_s19   ;;  %s6184_s18 = sphi %s6234_s18, %s7764_s18  }
   0x4   : > { %p25_p0 = scmp.ge.s32.totalorder %s24_s23, 2  ;;  %p4907_p1 = scmp.ge.s32.totalorder %s6200_s22, 1 }
   0x5   : > { %p216_p2 = scmp.lt.s32.totalorder %s6200_s22, 5 }
   0x6   : > { %s7769_s23 = smov (%p25_p0, %s24_s23), 0  ;;  %s7771_s24 = smov (!%p25_p0, %s27_s24), %s6196_s21 }
   0x7   : > { %p217_p3 = pnand %p4907_p1, %p216_p2  ;;  %p29_p4 = scmp.ge.s32.totalorder %s7771_s24, 2 }
   0x8   : > { %p253_p5 = scmp.lt.s32.totalorder (!%p217_p3), %s6188_s19, 1  ;;  %p255_p6 = scmp.lt.s32.totalorder (!%p217_p3), %s6184_s18, 1 }
   0x9   : > { %s7773_s24 = smov (%p29_p4, %s7771_s24), 0  ;;  %220 = sbr.rel (%p217_p3) target bundleno = 952 (0x3b8), region = 40 }
   0xa   : > { %s4910_s25 = sshll.u32 (!%p217_p3), %s6184_s18, 4  ;;  %p4914_p8 = scmp.ne.s32.totalorder (!%p217_p3), %s6184_s18, 0 }
   0xb   : > { %p262_p7 = scmp.lt.s32.totalorder (!%p217_p3), %s4910_s25, 31 }
   0xe   : > { %s7775_s19 = smov (!%p253_p5, %s6188_s19), 1  ;;  %s7777_s25 = smov (!%p262_p7, %s4910_s25), 31 }
   0xf   : > { %s256_s26 = scalar_select %p255_p6, %s6184_s18, 1 }
  0x10   : > { %s4908_s27 = sshll.u32 %s7775_s19, 1  ;;  %s5607_s29 = smul.u32 24, %s7775_s19 }
  0x11   : > { %s258_s28 = sadd.s32 %s4908_s27, %s256_s26  ;;  %s5430_s12 = sshll.u32 %s7777_s25, 6 }
  0x12   : > { %s4909_s30 = sshll.u32 %s258_s28, 2  ;;  %s6277_s11 = scalar_lea.vmem %s7763_s5, %s5607_s29 }
  0x13   : > { %s6272_s8 = scalar_lea.vmem %s7758_s0, %s4909_s30  ;;  %s6282_s15 = scalar_lea.vmem %s7759_s1, %s5430_s12 }
  0x14   : > { %277 = sbr.rel (%p4914_p8) target bundleno = 34 (0x22), region = 44 }
  0x19   : > { %v6202_v0 = vmov 0.0  }
  0x1a   : > { %278 = vst [vmem:[#allocation2 + $0x30] sm:$0xff] %v6202_v0  ;;  %279 = vst [vmem:[#allocation2] sm:$0xff] %v6202_v0 }
  0x1b   : > { %280 = vst [vmem:[#allocation2 + $0x58] sm:$0xff] %v6202_v0  ;;  %281 = vst [vmem:[#allocation2 + $0x18] sm:$0xff] %v6202_v0 }
  0x1c   : > { %282 = vst [vmem:[#allocation2 + $0x50] sm:$0xff] %v6202_v0  ;;  %283 = vst [vmem:[#allocation2 + $0x68] sm:$0xff] %v6202_v0 }
  0x1d   : > { %284 = vst [vmem:[#allocation2 + $0x8] sm:$0xff] %v6202_v0  ;;  %285 = vst [vmem:[#allocation2 + $0x48] sm:$0xff] %v6202_v0 }
  0x1e   : > { %286 = vst [vmem:[#allocation2 + $0x40] sm:$0xff] %v6202_v0  ;;  %287 = vst [vmem:[#allocation2 + $0x20] sm:$0xff] %v6202_v0 }
  0x1f   : > { %288 = vst [vmem:[#allocation2 + $0x10] sm:$0xff] %v6202_v0  ;;  %289 = vst [vmem:[#allocation2 + $0x38] sm:$0xff] %v6202_v0 }
  0x20   : > { %290 = vst [vmem:[#allocation2 + $0x60] sm:$0xff] %v6202_v0  ;;  %291 = vst [vmem:[#allocation2 + $0x70] sm:$0xff] %v6202_v0 }
  0x21   : > { %292 = vst [vmem:[#allocation2 + $0x78] sm:$0xff] %v6202_v0  ;;  %293 = vst [vmem:[#allocation2 + $0x28] sm:$0xff] %v6202_v0 }
  0x22 PF: > { %v423_v1 = vld [vmem:[%s6282_s15 + $0x380] sm:$0xff]  ;;  %v424_v3 = vld [vmem:[%s6282_s15 + $0x388] sm:$0xff]  ;;  %v6203_v9 = vmov 0   ;;  %v425_v0 = vld [vmem:[%s6282_s15 + $0x390] sm:$0xff]  ;;  %p5043_p9 = scmp.ne.s32.totalorder %s6184_s18, 1 }
  0x23   : > { %v431_v2 = vld [vmem:[%s6282_s15 + $0x3c0] sm:$0xff]  ;;  %v432_v5 = vld [vmem:[%s6282_s15 + $0x3c8] sm:$0xff]  ;;  %1111 = vmatprep.mubr.bf16.mxu0 %v6203_v9  ;;  %1152 = vmatprep.mubr.bf16.mxu1 %v6203_v9 }
  0x24   : > { %v5028_v4 = vcombine.high %v423_v1, %v431_v2  ;;  %v5027_v6 = vcombine.low %v423_v1, %v431_v2  ;;  %v407_v7 = vld [vmem:[%s6282_s15 + $0x300] sm:$0xff]  ;;  %v5030_v10 = vcombine.high %v424_v3, %v432_v5  ;;  %v5029_v11 = vcombine.low %v424_v3, %v432_v5  ;;  %v408_v13 = vld [vmem:[%s6282_s15 + $0x308] sm:$0xff]  ;;  %v433_v1 = vld [vmem:[%s6282_s15 + $0x3d0] sm:$0xff] }
  0x25   : > { %v415_v8 = vld [vmem:[%s6282_s15 + $0x340] sm:$0xff]  ;;  %v416_v14 = vld [vmem:[%s6282_s15 + $0x348] sm:$0xff]  ;;  %v426_v2 = vld [vmem:[%s6282_s15 + $0x398] sm:$0xff] }
  0x26   : > { %v5012_v12 = vcombine.high %v407_v7, %v415_v8  ;;  %v391_v15 = vld [vmem:[%s6282_s15 + $0x280] sm:$0xff]  ;;  %1079 = vmatprep.subr.bf16.mxu0 %v5028_v4  ;;  %v5014_v16 = vcombine.high %v408_v13, %v416_v14  ;;  %v392_v18 = vld [vmem:[%s6282_s15 + $0x288] sm:$0xff]  ;;  %1120 = vmatprep.subr.bf16.mxu1 %v5030_v10  ;;  %v5011_v20 = vcombine.low %v407_v7, %v415_v8  ;;  %v434_v3 = vld [vmem:[%s6282_s15 + $0x3d8] sm:$0xff] }
  0x27   : > { %v399_v17 = vld [vmem:[%s6282_s15 + $0x2c0] sm:$0xff]  ;;  %v400_v19 = vld [vmem:[%s6282_s15 + $0x2c8] sm:$0xff]  ;;  %1080 = vmatpush1.bf16.msra.mxu0 %v5027_v6  ;;  %1121 = vmatpush1.bf16.msra.mxu1 %v5029_v11  ;;  %v5013_v21 = vcombine.low %v408_v13, %v416_v14  ;;  %v5032_v6 = vcombine.high %v425_v0, %v433_v1  ;;  %v5034_v7 = vcombine.high %v426_v2, %v434_v3  ;;  %v409_v8 = vld [vmem:[%s6282_s15 + $0x310] sm:$0xff] }
  0x28   : > { %1081 = vmatprep.subr.bf16.mxu0 %v5012_v12  ;;  %v4996_v22 = vcombine.high %v391_v15, %v399_v17  ;;  %1122 = vmatprep.subr.bf16.mxu1 %v5014_v16  ;;  %v4998_v23 = vcombine.high %v392_v18, %v400_v19  ;;  %v375_v24 = vld [vmem:[%s6282_s15 + $0x200] sm:$0xff]  ;;  %v376_v26 = vld [vmem:[%s6282_s15 + $0x208] sm:$0xff]  ;;  %v4995_v28 = vcombine.low %v391_v15, %v399_v17  ;;  %v417_v10 = vld [vmem:[%s6282_s15 + $0x350] sm:$0xff] }
  0x29   : > { %v383_v25 = vld [vmem:[%s6282_s15 + $0x240] sm:$0xff]  ;;  %v384_v27 = vld [vmem:[%s6282_s15 + $0x248] sm:$0xff]  ;;  %v4997_v29 = vcombine.low %v392_v18, %v400_v19  ;;  %v410_v11 = vld [vmem:[%s6282_s15 + $0x318] sm:$0xff]  ;;  %v5031_v14 = vcombine.low %v425_v0, %v433_v1  ;;  %v5033_v15 = vcombine.low %v426_v2, %v434_v3  ;;  %v5016_v16 = vcombine.high %v409_v8, %v417_v10 }
  0x2a   : > { %v4980_v30 = vcombine.high %v375_v24, %v383_v25  ;;  %v4982_v31 = vcombine.high %v376_v26, %v384_v27  ;;  %v359_v32 = vld [vmem:[%s6282_s15 + $0x180] sm:$0xff]  ;;  %v360_v34 = vld [vmem:[%s6282_s15 + $0x188] sm:$0xff]  ;;  %v4979_v36 = vcombine.low %v375_v24, %v383_v25  ;;  %v4981_v37 = vcombine.low %v376_v26, %v384_v27  ;;  %v418_v12 = vld [vmem:[%s6282_s15 + $0x358] sm:$0xff] }
  0x2b   : > { %1082 = vmatpush1.bf16.msra.mxu0 %v5011_v20  ;;  %1123 = vmatpush1.bf16.msra.mxu1 %v5013_v21  ;;  %v367_v33 = vld [vmem:[%s6282_s15 + $0x1c0] sm:$0xff]  ;;  %v368_v35 = vld [vmem:[%s6282_s15 + $0x1c8] sm:$0xff]  ;;  %v5018_v17 = vcombine.high %v410_v11, %v418_v12  ;;  %v393_v18 = vld [vmem:[%s6282_s15 + $0x290] sm:$0xff] }
  0x2c   : > { %1083 = vmatprep.subr.bf16.mxu0 %v4996_v22  ;;  %1124 = vmatprep.subr.bf16.mxu1 %v4998_v23  ;;  %v4964_v38 = vcombine.high %v359_v32, %v367_v33  ;;  %v4966_v39 = vcombine.high %v360_v34, %v368_v35  ;;  %v343_v40 = vld [vmem:[%s6282_s15 + $0x100] sm:$0xff]  ;;  %v344_v42 = vld [vmem:[%s6282_s15 + $0x108] sm:$0xff]  ;;  %v4963_v44 = vcombine.low %v359_v32, %v367_v33  ;;  %v401_v19 = vld [vmem:[%s6282_s15 + $0x2d0] sm:$0xff] }
  0x2d   : > { %v351_v41 = vld [vmem:[%s6282_s15 + $0x140] sm:$0xff]  ;;  %v352_v43 = vld [vmem:[%s6282_s15 + $0x148] sm:$0xff]  ;;  %v4965_v45 = vcombine.low %v360_v34, %v368_v35  ;;  %v394_v20 = vld [vmem:[%s6282_s15 + $0x298] sm:$0xff]  ;;  %v5015_v22 = vcombine.low %v409_v8, %v417_v10  ;;  %v5017_v23 = vcombine.low %v410_v11, %v418_v12  ;;  %v5000_v24 = vcombine.high %v393_v18, %v401_v19 }
  0x2e   : > { %v4948_v46 = vcombine.high %v343_v40, %v351_v41  ;;  %v4950_v47 = vcombine.high %v344_v42, %v352_v43  ;;  %v327_v48 = vld [vmem:[%s6282_s15 + $0x80] sm:$0xff]  ;;  %v328_v50 = vld [vmem:[%s6282_s15 + $0x88] sm:$0xff]  ;;  %v4947_v52 = vcombine.low %v343_v40, %v351_v41  ;;  %v4949_v53 = vcombine.low %v344_v42, %v352_v43  ;;  %v402_v21 = vld [vmem:[%s6282_s15 + $0x2d8] sm:$0xff] }
  0x2f   : > { %1084 = vmatpush1.bf16.msra.mxu0 %v4995_v28  ;;  %1125 = vmatpush1.bf16.msra.mxu1 %v4997_v29  ;;  %v335_v49 = vld [vmem:[%s6282_s15 + $0xc0] sm:$0xff]  ;;  %v336_v51 = vld [vmem:[%s6282_s15 + $0xc8] sm:$0xff]  ;;  %v5002_v25 = vcombine.high %v394_v20, %v402_v21  ;;  %v377_v26 = vld [vmem:[%s6282_s15 + $0x210] sm:$0xff] }
  0x30   : > { %1085 = vmatprep.subr.bf16.mxu0 %v4980_v30  ;;  %1126 = vmatprep.subr.bf16.mxu1 %v4982_v31  ;;  %v4932_v54 = vcombine.high %v327_v48, %v335_v49  ;;  %v4934_v55 = vcombine.high %v328_v50, %v336_v51  ;;  %v311_v56 = vld [vmem:[%s6282_s15] sm:$0xff]  ;;  %v312_v58 = vld [vmem:[%s6282_s15 + $0x8] sm:$0xff]  ;;  %v4931_v60 = vcombine.low %v327_v48, %v335_v49  ;;  %v385_v27 = vld [vmem:[%s6282_s15 + $0x250] sm:$0xff] }
  0x31   : > { %v319_v57 = vld [vmem:[%s6282_s15 + $0x40] sm:$0xff]  ;;  %v320_v59 = vld [vmem:[%s6282_s15 + $0x48] sm:$0xff]  ;;  %v4933_v61 = vcombine.low %v328_v50, %v336_v51  ;;  %v378_v28 = vld [vmem:[%s6282_s15 + $0x218] sm:$0xff]  ;;  %v4999_v30 = vcombine.low %v393_v18, %v401_v19  ;;  %v5001_v31 = vcombine.low %v394_v20, %v402_v21  ;;  %v4984_v32 = vcombine.high %v377_v26, %v385_v27 }
  0x32   : > { %v4916_v62 = vcombine.high %v311_v56, %v319_v57  ;;  %v4918_v63 = vcombine.high %v312_v58, %v320_v59  ;;  %v4915_v4 = vcombine.low %v311_v56, %v319_v57  ;;  %v4917_v5 = vcombine.low %v312_v58, %v320_v59  ;;  %v6328_v13 = vld [vmem:[%s6272_s8] sm:$0xf]  ;;  %v386_v29 = vld [vmem:[%s6282_s15 + $0x258] sm:$0xff]  ;;  %v361_v34 = vld [vmem:[%s6282_s15 + $0x190] sm:$0xff] }
  0x33   : > { %1086 = vmatpush1.bf16.msra.mxu0 %v4979_v36  ;;  %1127 = vmatpush1.bf16.msra.mxu1 %v4981_v37  ;;  %v4986_v33 = vcombine.high %v378_v28, %v386_v29  ;;  %v369_v35 = vld [vmem:[%s6282_s15 + $0x1d0] sm:$0xff]  ;;  %v362_v36 = vld [vmem:[%s6282_s15 + $0x198] sm:$0xff]  ;;  %v427_v2 = vld [vmem:[%s6282_s15 + $0x3a0] sm:$0xff] }
  0x34   : > { %1087 = vmatprep.subr.bf16.mxu0 %v4964_v38  ;;  %1128 = vmatprep.subr.bf16.mxu1 %v4966_v39  ;;  %v370_v37 = vld [vmem:[%s6282_s15 + $0x1d8] sm:$0xff]  ;;  %v4983_v38 = vcombine.low %v377_v26, %v385_v27  ;;  %v4985_v39 = vcombine.low %v378_v28, %v386_v29  ;;  %v4968_v40 = vcombine.high %v361_v34, %v369_v35  ;;  %v345_v42 = vld [vmem:[%s6282_s15 + $0x110] sm:$0xff]  ;;  %v435_v3 = vld [vmem:[%s6282_s15 + $0x3e0] sm:$0xff] }
  0x35   : > { %v4970_v41 = vcombine.high %v362_v36, %v370_v37  ;;  %v353_v43 = vld [vmem:[%s6282_s15 + $0x150] sm:$0xff]  ;;  %v5036_v8 = vcombine.high %v427_v2, %v435_v3  ;;  %v411_v11 = vld [vmem:[%s6282_s15 + $0x320] sm:$0xff] }
  0x36   : > { %v4952_v48 = vcombine.high %v345_v42, %v353_v43  ;;  %v329_v50 = vld [vmem:[%s6282_s15 + $0x90] sm:$0xff]  ;;  %v419_v12 = vld [vmem:[%s6282_s15 + $0x360] sm:$0xff] }
  0x37   : > { %1088 = vmatpush1.bf16.msra.mxu0 %v4963_v44  ;;  %1129 = vmatpush1.bf16.msra.mxu1 %v4965_v45  ;;  %v346_v44 = vld [vmem:[%s6282_s15 + $0x118] sm:$0xff]  ;;  %v337_v51 = vld [vmem:[%s6282_s15 + $0xd0] sm:$0xff]  ;;  %v5020_v18 = vcombine.high %v411_v11, %v419_v12  ;;  %v395_v20 = vld [vmem:[%s6282_s15 + $0x2a0] sm:$0xff] }
  0x38   : > { %1089 = vmatprep.subr.bf16.mxu0 %v4948_v46  ;;  %1130 = vmatprep.subr.bf16.mxu1 %v4950_v47  ;;  %v354_v45 = vld [vmem:[%s6282_s15 + $0x158] sm:$0xff]  ;;  %v4967_v46 = vcombine.low %v361_v34, %v369_v35  ;;  %v4969_v47 = vcombine.low %v362_v36, %v370_v37  ;;  %v4936_v56 = vcombine.high %v329_v50, %v337_v51  ;;  %v313_v58 = vld [vmem:[%s6282_s15 + $0x10] sm:$0xff]  ;;  %v403_v21 = vld [vmem:[%s6282_s15 + $0x2e0] sm:$0xff] }
  0x39   : > { %v4954_v49 = vcombine.high %v346_v44, %v354_v45  ;;  %v321_v59 = vld [vmem:[%s6282_s15 + $0x50] sm:$0xff]  ;;  %v5004_v26 = vcombine.high %v395_v20, %v403_v21  ;;  %v379_v28 = vld [vmem:[%s6282_s15 + $0x220] sm:$0xff] }
  0x3a   : > { %v4920_v0 = vcombine.high %v313_v58, %v321_v59  ;;  %v387_v29 = vld [vmem:[%s6282_s15 + $0x260] sm:$0xff] }
  0x3b   : > { %1090 = vmatpush1.bf16.msra.mxu0 %v4947_v52  ;;  %1131 = vmatpush1.bf16.msra.mxu1 %v4949_v53  ;;  %v330_v52 = vld [vmem:[%s6282_s15 + $0x98] sm:$0xff]  ;;  %v4988_v34 = vcombine.high %v379_v28, %v387_v29  ;;  %v363_v36 = vld [vmem:[%s6282_s15 + $0x1a0] sm:$0xff] }
  0x3c   : > { %1091 = vmatprep.subr.bf16.mxu0 %v4932_v54  ;;  %1132 = vmatprep.subr.bf16.mxu1 %v4934_v55  ;;  %v338_v53 = vld [vmem:[%s6282_s15 + $0xd8] sm:$0xff]  ;;  %v4951_v54 = vcombine.low %v345_v42, %v353_v43  ;;  %v4953_v55 = vcombine.low %v346_v44, %v354_v45  ;;  %v371_v37 = vld [vmem:[%s6282_s15 + $0x1e0] sm:$0xff] }
  0x3d   : > { %v4938_v57 = vcombine.high %v330_v52, %v338_v53  ;;  %v4972_v42 = vcombine.high %v363_v36, %v371_v37  ;;  %v347_v44 = vld [vmem:[%s6282_s15 + $0x120] sm:$0xff] }
  0x3e   : > { %v355_v45 = vld [vmem:[%s6282_s15 + $0x160] sm:$0xff] }
  0x3f   : > { %1092 = vmatpush1.bf16.msra.mxu0 %v4931_v60  ;;  %1133 = vmatpush1.bf16.msra.mxu1 %v4933_v61  ;;  %v314_v60 = vld [vmem:[%s6282_s15 + $0x18] sm:$0xff] }
  0x40   : > { %1093 = vmatprep.subr.bf16.mxu0 %v4916_v62  ;;  %1134 = vmatprep.subr.bf16.mxu1 %v4918_v63  ;;  %v322_v61 = vld [vmem:[%s6282_s15 + $0x58] sm:$0xff]  ;;  %v4935_v62 = vcombine.low %v329_v50, %v337_v51  ;;  %v4937_v63 = vcombine.low %v330_v52, %v338_v53  ;;  %v4956_v50 = vcombine.high %v347_v44, %v355_v45  ;;  %v331_v52 = vld [vmem:[%s6282_s15 + $0xa0] sm:$0xff] }
  0x41   : > { %v4922_v1 = vcombine.high %v314_v60, %v322_v61  ;;  %v339_v53 = vld [vmem:[%s6282_s15 + $0xe0] sm:$0xff] }
  0x43   : > { %1094 = vmatpush1.bf16.msra.mxu0 %v4915_v4  ;;  %1135 = vmatpush1.bf16.msra.mxu1 %v4917_v5  ;;  %v428_v4 = vld [vmem:[%s6282_s15 + $0x3a8] sm:$0xff] }
  0x44   : > { %1161 = vmatprep.subr.bf16.mxu0 %v5032_v6  ;;  %1202 = vmatprep.subr.bf16.mxu1 %v5034_v7  ;;  %v436_v5 = vld [vmem:[%s6282_s15 + $0x3e8] sm:$0xff]  ;;  %v4919_v6 = vcombine.low %v313_v58, %v321_v59  ;;  %v4921_v7 = vcombine.low %v314_v60, %v322_v61  ;;  %v4940_v58 = vcombine.high %v331_v52, %v339_v53  ;;  %v315_v60 = vld [vmem:[%s6282_s15 + $0x20] sm:$0xff] }
  0x45   : > { %v5038_v10 = vcombine.high %v428_v4, %v436_v5  ;;  %v323_v61 = vld [vmem:[%s6282_s15 + $0x60] sm:$0xff] }
  0x46   : > { %1112 = vmatmul.mubr.bf16.vlgmr.msra.gmra.mxu0 %v6328_v13  ;;  %1153 = vmatmul.mubr.bf16.vlgmr.msra.gmra.mxu1 %v6328_v13 }
  0x47   : > { %1162 = vmatpush1.bf16.msra.mxu0 %v5031_v14  ;;  %1203 = vmatpush1.bf16.msra.mxu1 %v5033_v15  ;;  %v412_v14 = vld [vmem:[%s6282_s15 + $0x328] sm:$0xff] }
  0x48   : > { %1163 = vmatprep.subr.bf16.mxu0 %v5016_v16  ;;  %1204 = vmatprep.subr.bf16.mxu1 %v5018_v17  ;;  %v420_v15 = vld [vmem:[%s6282_s15 + $0x368] sm:$0xff]  ;;  %v5035_v16 = vcombine.low %v427_v2, %v435_v3  ;;  %v5037_v17 = vcombine.low %v428_v4, %v436_v5  ;;  %v4924_v2 = vcombine.high %v315_v60, %v323_v61  ;;  %v429_v4 = vld [vmem:[%s6282_s15 + $0x3b0] sm:$0xff] }
  0x49   : > { %1193 = vmatprep.mubr.bf16.mxu0 %v6203_v9  ;;  %1234 = vmatprep.mubr.bf16.mxu1 %v6203_v9  ;;  %v5022_v19 = vcombine.high %v412_v14, %v420_v15  ;;  %v437_v5 = vld [vmem:[%s6282_s15 + $0x3f0] sm:$0xff] }
  0x4b   : > { %1164 = vmatpush1.bf16.msra.mxu0 %v5015_v22  ;;  %1205 = vmatpush1.bf16.msra.mxu1 %v5017_v23  ;;  %v396_v22 = vld [vmem:[%s6282_s15 + $0x2a8] sm:$0xff] }
  0x4c   : > { %1165 = vmatprep.subr.bf16.mxu0 %v5000_v24  ;;  %1206 = vmatprep.subr.bf16.mxu1 %v5002_v25  ;;  %v404_v23 = vld [vmem:[%s6282_s15 + $0x2e8] sm:$0xff]  ;;  %v5019_v24 = vcombine.low %v411_v11, %v419_v12  ;;  %v5021_v25 = vcombine.low %v412_v14, %v420_v15  ;;  %v5040_v11 = vcombine.high %v429_v4, %v437_v5  ;;  %v413_v14 = vld [vmem:[%s6282_s15 + $0x330] sm:$0xff] }
  0x4d   : > { %v5006_v27 = vcombine.high %v396_v22, %v404_v23  ;;  %v421_v15 = vld [vmem:[%s6282_s15 + $0x370] sm:$0xff] }
  0x4f   : > { %1166 = vmatpush1.bf16.msra.mxu0 %v4999_v30  ;;  %1207 = vmatpush1.bf16.msra.mxu1 %v5001_v31  ;;  %v380_v30 = vld [vmem:[%s6282_s15 + $0x228] sm:$0xff] }
  0x50   : > { %1167 = vmatprep.subr.bf16.mxu0 %v4984_v32  ;;  %1208 = vmatprep.subr.bf16.mxu1 %v4986_v33  ;;  %v388_v31 = vld [vmem:[%s6282_s15 + $0x268] sm:$0xff]  ;;  %v5003_v32 = vcombine.low %v395_v20, %v403_v21  ;;  %v5005_v33 = vcombine.low %v396_v22, %v404_v23  ;;  %v5024_v20 = vcombine.high %v413_v14, %v421_v15  ;;  %v397_v22 = vld [vmem:[%s6282_s15 + $0x2b0] sm:$0xff] }
  0x51   : > { %v4990_v35 = vcombine.high %v380_v30, %v388_v31  ;;  %v405_v23 = vld [vmem:[%s6282_s15 + $0x2f0] sm:$0xff] }
  0x53   : > { %1168 = vmatpush1.bf16.msra.mxu0 %v4983_v38  ;;  %1209 = vmatpush1.bf16.msra.mxu1 %v4985_v39  ;;  %v364_v38 = vld [vmem:[%s6282_s15 + $0x1a8] sm:$0xff] }
  0x54   : > { %1169 = vmatprep.subr.bf16.mxu0 %v4968_v40  ;;  %1210 = vmatprep.subr.bf16.mxu1 %v4970_v41  ;;  %v372_v39 = vld [vmem:[%s6282_s15 + $0x1e8] sm:$0xff]  ;;  %v4987_v40 = vcombine.low %v379_v28, %v387_v29  ;;  %v4989_v41 = vcombine.low %v380_v30, %v388_v31  ;;  %v5008_v28 = vcombine.high %v397_v22, %v405_v23  ;;  %v381_v30 = vld [vmem:[%s6282_s15 + $0x230] sm:$0xff] }
  0x55   : > { %v4974_v43 = vcombine.high %v364_v38, %v372_v39  ;;  %v389_v31 = vld [vmem:[%s6282_s15 + $0x270] sm:$0xff] }
  0x57   : > { %1170 = vmatpush1.bf16.msra.mxu0 %v4967_v46  ;;  %1211 = vmatpush1.bf16.msra.mxu1 %v4969_v47  ;;  %v348_v46 = vld [vmem:[%s6282_s15 + $0x128] sm:$0xff] }
  0x58   : > { %1171 = vmatprep.subr.bf16.mxu0 %v4952_v48  ;;  %1212 = vmatprep.subr.bf16.mxu1 %v4954_v49  ;;  %v356_v47 = vld [vmem:[%s6282_s15 + $0x168] sm:$0xff]  ;;  %v4971_v48 = vcombine.low %v363_v36, %v371_v37  ;;  %v4973_v49 = vcombine.low %v364_v38, %v372_v39  ;;  %v4992_v36 = vcombine.high %v381_v30, %v389_v31  ;;  %v365_v38 = vld [vmem:[%s6282_s15 + $0x1b0] sm:$0xff] }
  0x59   : > { %v4958_v51 = vcombine.high %v348_v46, %v356_v47  ;;  %v373_v39 = vld [vmem:[%s6282_s15 + $0x1f0] sm:$0xff] }
  0x5b   : > { %1172 = vmatpush1.bf16.msra.mxu0 %v4951_v54  ;;  %1213 = vmatpush1.bf16.msra.mxu1 %v4953_v55  ;;  %v332_v54 = vld [vmem:[%s6282_s15 + $0xa8] sm:$0xff] }
  0x5c   : > { %1173 = vmatprep.subr.bf16.mxu0 %v4936_v56  ;;  %1214 = vmatprep.subr.bf16.mxu1 %v4938_v57  ;;  %v340_v55 = vld [vmem:[%s6282_s15 + $0xe8] sm:$0xff]  ;;  %v4955_v56 = vcombine.low %v347_v44, %v355_v45  ;;  %v4957_v57 = vcombine.low %v348_v46, %v356_v47  ;;  %v349_v45 = vld [vmem:[%s6282_s15 + $0x130] sm:$0xff]  ;;  %v350_v47 = vld [vmem:[%s6282_s15 + $0x138] sm:$0xff] }
  0x5d   : > { %v4942_v59 = vcombine.high %v332_v54, %v340_v55  ;;  %v357_v46 = vld [vmem:[%s6282_s15 + $0x170] sm:$0xff] }
  0x5f   : > { %1174 = vmatpush1.bf16.msra.mxu0 %v4935_v62  ;;  %1215 = vmatpush1.bf16.msra.mxu1 %v4937_v63  ;;  %v316_v62 = vld [vmem:[%s6282_s15 + $0x28] sm:$0xff] }
  0x60   : > { %1175 = vmatprep.subr.bf16.mxu0 %v4920_v0  ;;  %1216 = vmatprep.subr.bf16.mxu1 %v4922_v1  ;;  %v324_v63 = vld [vmem:[%s6282_s15 + $0x68] sm:$0xff]  ;;  %v4939_v0 = vcombine.low %v331_v52, %v339_v53  ;;  %v4941_v1 = vcombine.low %v332_v54, %v340_v55  ;;  %v333_v53 = vld [vmem:[%s6282_s15 + $0xb0] sm:$0xff]  ;;  %v334_v55 = vld [vmem:[%s6282_s15 + $0xb8] sm:$0xff] }
  0x61   : > { %v4926_v3 = vcombine.high %v316_v62, %v324_v63  ;;  %v341_v54 = vld [vmem:[%s6282_s15 + $0xf0] sm:$0xff] }
  0x63   : > { %1176 = vmatpush1.bf16.msra.mxu0 %v4919_v6  ;;  %1217 = vmatpush1.bf16.msra.mxu1 %v4921_v7  ;;  %v430_v6 = vld [vmem:[%s6282_s15 + $0x3b8] sm:$0xff] }
  0x64   : > { %1243 = vmatprep.subr.bf16.mxu0 %v5036_v8  ;;  %1284 = vmatprep.subr.bf16.mxu1 %v5038_v10  ;;  %v438_v7 = vld [vmem:[%s6282_s15 + $0x3f8] sm:$0xff]  ;;  %v4923_v8 = vcombine.low %v315_v60, %v323_v61  ;;  %v4925_v10 = vcombine.low %v316_v62, %v324_v63  ;;  %v317_v61 = vld [vmem:[%s6282_s15 + $0x30] sm:$0xff] }
  0x65   : > { %v5042_v12 = vcombine.high %v430_v6, %v438_v7  ;;  %v325_v62 = vld [vmem:[%s6282_s15 + $0x70] sm:$0xff]  ;;  %v318_v63 = vld [vmem:[%s6282_s15 + $0x38] sm:$0xff] }
  0x66   : > { %1194 = vmatmul.mubr.bf16.vlgmr.msra.gmra.mxu0 %v6328_v13  ;;  %1235 = vmatmul.mubr.bf16.vlgmr.msra.gmra.mxu1 %v6328_v13 }
  0x67   : > { %1244 = vmatpush1.bf16.msra.mxu0 %v5035_v16  ;;  %1285 = vmatpush1.bf16.msra.mxu1 %v5037_v17  ;;  %v414_v16 = vld [vmem:[%s6282_s15 + $0x338] sm:$0xff] }
  0x68   : > { %1245 = vmatprep.subr.bf16.mxu0 %v5020_v18  ;;  %1286 = vmatprep.subr.bf16.mxu1 %v5022_v19  ;;  %v422_v17 = vld [vmem:[%s6282_s15 + $0x378] sm:$0xff]  ;;  %v5039_v18 = vcombine.low %v429_v4, %v437_v5  ;;  %v5041_v19 = vcombine.low %v430_v6, %v438_v7  ;;  %v4927_v5 = vcombine.low %v317_v61, %v325_v62  ;;  %v294_v7 = vld [vmem:[#allocation2 + $0x30] sm:$0xff] }
  0x69   : > { %1275 = vmatprep.mubr.bf16.mxu0 %v6203_v9  ;;  %1316 = vmatprep.mubr.bf16.mxu1 %v6203_v9  ;;  %v5026_v21 = vcombine.high %v414_v16, %v422_v17 }
  0x6b   : > { %1246 = vmatpush1.bf16.msra.mxu0 %v5019_v24  ;;  %1287 = vmatpush1.bf16.msra.mxu1 %v5021_v25  ;;  %v398_v24 = vld [vmem:[%s6282_s15 + $0x2b8] sm:$0xff] }
  0x6c   : > { %1247 = vmatprep.subr.bf16.mxu0 %v5004_v26  ;;  %1288 = vmatprep.subr.bf16.mxu1 %v5006_v27  ;;  %v406_v25 = vld [vmem:[%s6282_s15 + $0x2f8] sm:$0xff]  ;;  %v5023_v26 = vcombine.low %v413_v14, %v421_v15  ;;  %v5025_v27 = vcombine.low %v414_v16, %v422_v17 }
  0x6d   : > { %v5010_v29 = vcombine.high %v398_v24, %v406_v25  ;;  %v297_v15 = vld [vmem:[#allocation2 + $0x18] sm:$0xff] }
  0x6f   : > { %1248 = vmatpush1.bf16.msra.mxu0 %v5003_v32  ;;  %1289 = vmatpush1.bf16.msra.mxu1 %v5005_v33  ;;  %v382_v32 = vld [vmem:[%s6282_s15 + $0x238] sm:$0xff] }
  0x70   : > { %1249 = vmatprep.subr.bf16.mxu0 %v4988_v34  ;;  %1290 = vmatprep.subr.bf16.mxu1 %v4990_v35  ;;  %v390_v33 = vld [vmem:[%s6282_s15 + $0x278] sm:$0xff]  ;;  %v5007_v34 = vcombine.low %v397_v22, %v405_v23  ;;  %v5009_v35 = vcombine.low %v398_v24, %v406_v25  ;;  %v298_v24 = vld [vmem:[#allocation2 + $0x50] sm:$0xff]  ;;  %v300_v25 = vld [vmem:[#allocation2 + $0x8] sm:$0xff] }
  0x71   : > { %v4994_v37 = vcombine.high %v382_v32, %v390_v33 }
  0x73   : > { %1250 = vmatpush1.bf16.msra.mxu0 %v4987_v40  ;;  %1291 = vmatpush1.bf16.msra.mxu1 %v4989_v41  ;;  %v366_v40 = vld [vmem:[%s6282_s15 + $0x1b8] sm:$0xff] }
  0x74   : > { %1251 = vmatprep.subr.bf16.mxu0 %v4972_v42  ;;  %1292 = vmatprep.subr.bf16.mxu1 %v4974_v43  ;;  %v374_v41 = vld [vmem:[%s6282_s15 + $0x1f8] sm:$0xff]  ;;  %v4991_v42 = vcombine.low %v381_v30, %v389_v31  ;;  %v4976_v43 = vcombine.high %v365_v38, %v373_v39  ;;  %v301_v30 = vld [vmem:[#allocation2 + $0x48] sm:$0xff] }
  0x75   : > { %v4978_v44 = vcombine.high %v366_v40, %v374_v41 }
  0x77   : > { %1252 = vmatpush1.bf16.msra.mxu0 %v4971_v48  ;;  %1293 = vmatpush1.bf16.msra.mxu1 %v4973_v49  ;;  %v358_v48 = vld [vmem:[%s6282_s15 + $0x178] sm:$0xff]  ;;  %v4975_v49 = vcombine.low %v365_v38, %v373_v39 }
  0x78   : > { %1253 = vmatprep.subr.bf16.mxu0 %v4956_v50  ;;  %1294 = vmatprep.subr.bf16.mxu1 %v4958_v51  ;;  %v4977_v50 = vcombine.low %v366_v40, %v374_v41  ;;  %v4960_v51 = vcombine.high %v349_v45, %v357_v46  ;;  %v4962_v52 = vcombine.high %v350_v47, %v358_v48  ;;  %v302_v40 = vld [vmem:[#allocation2 + $0x40] sm:$0xff]  ;;  %v304_v41 = vld [vmem:[#allocation2 + $0x10] sm:$0xff] }
  0x7b   : > { %1254 = vmatpush1.bf16.msra.mxu0 %v4955_v56  ;;  %1295 = vmatpush1.bf16.msra.mxu1 %v4957_v57  ;;  %v342_v56 = vld [vmem:[%s6282_s15 + $0xf8] sm:$0xff]  ;;  %v4959_v57 = vcombine.low %v349_v45, %v357_v46 }
  0x7c   : > { %1255 = vmatprep.subr.bf16.mxu0 %v4940_v58  ;;  %1296 = vmatprep.subr.bf16.mxu1 %v4942_v59  ;;  %v4961_v58 = vcombine.low %v350_v47, %v358_v48  ;;  %v4944_v59 = vcombine.high %v333_v53, %v341_v54  ;;  %v4946_v60 = vcombine.high %v334_v55, %v342_v56  ;;  %v305_v45 = vld [vmem:[#allocation2 + $0x38] sm:$0xff] }
  0x7f   : > { %1256 = vmatpush1.bf16.msra.mxu0 %v4939_v0  ;;  %1297 = vmatpush1.bf16.msra.mxu1 %v4941_v1  ;;  %v326_v0 = vld [vmem:[%s6282_s15 + $0x78] sm:$0xff]  ;;  %v4943_v1 = vcombine.low %v333_v53, %v341_v54 }
  0x80   : > { %1257 = vmatprep.subr.bf16.mxu0 %v4924_v2  ;;  %1298 = vmatprep.subr.bf16.mxu1 %v4926_v3  ;;  %v4945_v2 = vcombine.low %v334_v55, %v342_v56  ;;  %v4928_v3 = vcombine.high %v317_v61, %v325_v62  ;;  %v4930_v4 = vcombine.high %v318_v63, %v326_v0  ;;  %v306_v55 = vld [vmem:[#allocation2 + $0x60] sm:$0xff]  ;;  %v308_v56 = vld [vmem:[#allocation2 + $0x78] sm:$0xff]  ;;  %v309_v61 = vld [vmem:[#allocation2 + $0x28] sm:$0xff] }
  0x81   : > { %v4929_v6 = vcombine.low %v318_v63, %v326_v0 }
  0x83   : > { %1258 = vmatpush1.bf16.msra.mxu0 %v4923_v8  ;;  %1299 = vmatpush1.bf16.msra.mxu1 %v4925_v10  ;;  %v296_v8 = vld [vmem:[#allocation2 + $0x58] sm:$0xff] }
  0x84   : > { %1325 = vmatprep.subr.bf16.mxu0 %v5040_v11  ;;  %1366 = vmatprep.subr.bf16.mxu1 %v5042_v12  ;;  %v295_v11 = vld [vmem:[#allocation2] sm:$0xff] }
  0x86   : > { %1276 = vmatmul.mubr.bf16.vlgmr.msra.gmra.mxu0 %v6328_v13  ;;  %1317 = vmatmul.mubr.bf16.vlgmr.msra.gmra.mxu1 %v6328_v13 }
  0x87   : > { %1326 = vmatpush1.bf16.msra.mxu0 %v5039_v18  ;;  %1367 = vmatpush1.bf16.msra.mxu1 %v5041_v19 }
  0x88   : > { %1327 = vmatprep.subr.bf16.mxu0 %v5024_v20  ;;  %1368 = vmatprep.subr.bf16.mxu1 %v5026_v21 }
  0x89   : > { %1357 = vmatprep.mubr.bf16.mxu0 %v6203_v9  ;;  %1398 = vmatprep.mubr.bf16.mxu1 %v6203_v9  ;;  %v4993_v9 = vcombine.low %v382_v32, %v390_v33 }
  0x8b   : > { %1328 = vmatpush1.bf16.msra.mxu0 %v5023_v26  ;;  %1369 = vmatpush1.bf16.msra.mxu1 %v5025_v27  ;;  %v299_v27 = vld [vmem:[#allocation2 + $0x68] sm:$0xff] }
  0x8c   : > { %1329 = vmatprep.subr.bf16.mxu0 %v5008_v28  ;;  %1370 = vmatprep.subr.bf16.mxu1 %v5010_v29 }
  0x8f   : > { %1330 = vmatpush1.bf16.msra.mxu0 %v5007_v34  ;;  %1371 = vmatpush1.bf16.msra.mxu1 %v5009_v35 }
  0x90   : > { %1331 = vmatprep.subr.bf16.mxu0 %v4992_v36  ;;  %1372 = vmatprep.subr.bf16.mxu1 %v4994_v37 }
  0x93   : > { %1332 = vmatpush1.bf16.msra.mxu0 %v4991_v42  ;;  %1373 = vmatpush1.bf16.msra.mxu1 %v4993_v9  ;;  %v303_v9 = vld [vmem:[#allocation2 + $0x20] sm:$0xff] }
  0x94   : > { %1333 = vmatprep.subr.bf16.mxu0 %v4976_v43  ;;  %1374 = vmatprep.subr.bf16.mxu1 %v4978_v44 }
  0x97   : > { %1334 = vmatpush1.bf16.msra.mxu0 %v4975_v49  ;;  %1375 = vmatpush1.bf16.msra.mxu1 %v4977_v50 }
  0x98   : > { %1335 = vmatprep.subr.bf16.mxu0 %v4960_v51  ;;  %1376 = vmatprep.subr.bf16.mxu1 %v4962_v52 }
  0x9b   : > { %1336 = vmatpush1.bf16.msra.mxu0 %v4959_v57  ;;  %1377 = vmatpush1.bf16.msra.mxu1 %v4961_v58  ;;  %v307_v58 = vld [vmem:[#allocation2 + $0x70] sm:$0xff] }
  0x9c   : > { %1337 = vmatprep.subr.bf16.mxu0 %v4944_v59  ;;  %1378 = vmatprep.subr.bf16.mxu1 %v4946_v60 }
  0x9f   : > { %1338 = vmatpush1.bf16.msra.mxu0 %v4943_v1  ;;  %1379 = vmatpush1.bf16.msra.mxu1 %v4945_v2 }
  0xa0   : > { %1339 = vmatprep.subr.bf16.mxu0 %v4928_v3  ;;  %1380 = vmatprep.subr.bf16.mxu1 %v4930_v4 }
  0xa3   : > { %1340 = vmatpush1.bf16.msra.mxu0 %v4927_v5  ;;  %1381 = vmatpush1.bf16.msra.mxu1 %v4929_v6 }
  0xa6   : > { %1358 = vmatmul.mubr.bf16.vlgmr.msra.gmra.mxu0 %v6328_v13  ;;  %1399 = vmatmul.mubr.bf16.vlgmr.msra.gmra.mxu1 %v6328_v13 }
 0x106   : > { %v1113_v10 = vpop.f32.mrf.mxu0  ;;  %v1154_v14 = vpop.f32.mrf.mxu1 }
 0x107   : > { %v1407_v12 = vadd.f32 %v1113_v10, %v294_v7  ;;  %v1409_v16 = vadd.f32 %v1154_v14, %v296_v8 }
 0x108   : > { %v1115_v17 = vpop.f32.mrf.mxu0  ;;  %v1156_v19 = vpop.f32.mrf.mxu1 }
 0x109   : > { %1423 = vst [vmem:[#allocation2 + $0x30] sm:$0xff] %v1407_v12  ;;  %v1408_v18 = vadd.f32 %v1115_v17, %v295_v11  ;;  %1425 = vst [vmem:[#allocation2 + $0x58] sm:$0xff] %v1409_v16  ;;  %v1410_v20 = vadd.f32 %v1156_v19, %v297_v15 }
 0x10a   : > { %v1117_v21 = vpop.f32.mrf.mxu0  ;;  %v1158_v22 = vpop.f32.mrf.mxu1 }
 0x10b   : > { %1424 = vst [vmem:[#allocation2] sm:$0xff] %v1408_v18  ;;  %1426 = vst [vmem:[#allocation2 + $0x18] sm:$0xff] %v1410_v20 }
 0x10c   : > { %v1118_v23 = vpop.f32.mrf.mxu0  ;;  %v1159_v13 = vpop.f32.mrf.mxu1 }
 0x126   : > { %v1195_v26 = vpop.f32.mrf.mxu0  ;;  %v1236_v29 = vpop.f32.mrf.mxu1 }
 0x127   : > { %v1411_v28 = vadd.f32 %v1195_v26, %v298_v24  ;;  %v1413_v31 = vadd.f32 %v1236_v29, %v300_v25 }
 0x128   : > { %v1197_v32 = vpop.f32.mrf.mxu0  ;;  %v1238_v34 = vpop.f32.mrf.mxu1 }
 0x129   : > { %1427 = vst [vmem:[#allocation2 + $0x50] sm:$0xff] %v1411_v28  ;;  %v1412_v33 = vadd.f32 %v1197_v32, %v299_v27  ;;  %1429 = vst [vmem:[#allocation2 + $0x8] sm:$0xff] %v1413_v31  ;;  %v1414_v35 = vadd.f32 %v1238_v34, %v301_v30 }
 0x12a   : > { %v1199_v36 = vpop.f32.mrf.mxu0  ;;  %v1240_v37 = vpop.f32.mrf.mxu1 }
 0x12b   : > { %1428 = vst [vmem:[#allocation2 + $0x68] sm:$0xff] %v1412_v33  ;;  %1430 = vst [vmem:[#allocation2 + $0x48] sm:$0xff] %v1414_v35 }
 0x12c   : > { %v1200_v38 = vpop.f32.mrf.mxu0  ;;  %v1241_v39 = vpop.f32.mrf.mxu1 }
 0x146   : > { %v1277_v42 = vpop.f32.mrf.mxu0  ;;  %v1318_v44 = vpop.f32.mrf.mxu1 }
 0x147   : > { %v1415_v43 = vadd.f32 %v1277_v42, %v302_v40  ;;  %v1417_v46 = vadd.f32 %v1318_v44, %v304_v41 }
 0x148   : > { %v1279_v47 = vpop.f32.mrf.mxu0  ;;  %v1320_v49 = vpop.f32.mrf.mxu1 }
 0x149   : > { %1431 = vst [vmem:[#allocation2 + $0x40] sm:$0xff] %v1415_v43  ;;  %v1416_v48 = vadd.f32 %v1279_v47, %v303_v9  ;;  %1433 = vst [vmem:[#allocation2 + $0x10] sm:$0xff] %v1417_v46  ;;  %v1418_v50 = vadd.f32 %v1320_v49, %v305_v45 }
 0x14a   : > { %v1281_v51 = vpop.f32.mrf.mxu0  ;;  %v1322_v52 = vpop.f32.mrf.mxu1 }
 0x14b   : > { %1432 = vst [vmem:[#allocation2 + $0x20] sm:$0xff] %v1416_v48  ;;  %1434 = vst [vmem:[#allocation2 + $0x38] sm:$0xff] %v1418_v50 }
 0x14c   : > { %v1282_v53 = vpop.f32.mrf.mxu0  ;;  %v1323_v54 = vpop.f32.mrf.mxu1 }
 0x166   : > { %v1359_v57 = vpop.f32.mrf.mxu0  ;;  %v1400_v60 = vpop.f32.mrf.mxu1 }
 0x167   : > { %v1419_v59 = vadd.f32 %v1359_v57, %v306_v55  ;;  %v1421_v62 = vadd.f32 %v1400_v60, %v308_v56 }
 0x168   : > { %v1361_v63 = vpop.f32.mrf.mxu0  ;;  %v1402_v1 = vpop.f32.mrf.mxu1  ;;  %1442 = sbr.rel (%p5043_p9) target bundleno = 952 (0x3b8), region = 48 }
 0x169   : > { %1435 = vst [vmem:[#allocation2 + $0x60] sm:$0xff] %v1419_v59  ;;  %v1420_v0 = vadd.f32 %v1361_v63, %v307_v58  ;;  %1437 = vst [vmem:[#allocation2 + $0x78] sm:$0xff] %v1421_v62  ;;  %v1422_v2 = vadd.f32 %v1402_v1, %v309_v61 }
 0x16a   : > { %v1363_v3 = vpop.f32.mrf.mxu0  ;;  %v1404_v4 = vpop.f32.mrf.mxu1 }
 0x16b   : > { %1436 = vst [vmem:[#allocation2 + $0x70] sm:$0xff] %v1420_v0  ;;  %1438 = vst [vmem:[#allocation2 + $0x28] sm:$0xff] %v1422_v2 }
 0x16c   : > { %v1364_v5 = vpop.f32.mrf.mxu0  ;;  %v1405_v6 = vpop.f32.mrf.mxu1 }
 0x16d   : > { %v5650_v7 = vld [vmem:[%s7761_s3 + $0xac] ss:$12 sps:$4 sm:$0xff]   ;;  %v5654_v10 = vld [vmem:[%s7761_s3 + $0xa8] ss:$12 sps:$4 sm:$0xff]   ;;  %v5660_v15 = vld [vmem:[%s7761_s3 + $0x90] ss:$12 sps:$4 sm:$0xff]   ;;  %v1463_v44 = vlaneseq }
 0x16e   : > { %v5652_v8 = vld [vmem:[%s7761_s3 + $0x22c] ss:$12 sps:$4 sm:$0xff]   ;;  %4168 = vmatprep.subr.bf16.mxu0 %v5650_v7  ;;  %v5655_v11 = vld [vmem:[%s7761_s3 + $0x228] ss:$12 sps:$4 sm:$0xff]   ;;  %v5661_v16 = vld [vmem:[%s7761_s3 + $0x210] ss:$12 sps:$4 sm:$0xff]  }
 0x16f   : > { %4209 = vmatprep.subr.bf16.mxu1 %v5652_v8  ;;  %v5656_v12 = vld [vmem:[%s7761_s3 + $0x94] ss:$12 sps:$4 sm:$0xff]   ;;  %4169 = vmatpush1.bf16.msra.mxu0 %v5654_v10  ;;  %v5662_v17 = vld [vmem:[%s7761_s3 + $0x7c] ss:$12 sps:$4 sm:$0xff]   ;;  %v5666_v19 = vld [vmem:[%s7761_s3 + $0x78] ss:$12 sps:$4 sm:$0xff]  }
 0x170   : > { %4210 = vmatpush1.bf16.msra.mxu1 %v5655_v11  ;;  %v5658_v14 = vld [vmem:[%s7761_s3 + $0x214] ss:$12 sps:$4 sm:$0xff]   ;;  %4170 = vmatprep.subr.bf16.mxu0 %v5656_v12  ;;  %v5664_v18 = vld [vmem:[%s7761_s3 + $0x1fc] ss:$12 sps:$4 sm:$0xff]   ;;  %v5667_v20 = vld [vmem:[%s7761_s3 + $0x1f8] ss:$12 sps:$4 sm:$0xff]  }
 0x171   : > { %4211 = vmatprep.subr.bf16.mxu1 %v5658_v14  ;;  %v5668_v21 = vld [vmem:[%s7761_s3 + $0x64] ss:$12 sps:$4 sm:$0xff]   ;;  %v5672_v23 = vld [vmem:[%s7761_s3 + $0x60] ss:$12 sps:$4 sm:$0xff]   ;;  %v5678_v26 = vld [vmem:[%s7761_s3 + $0x48] ss:$12 sps:$4 sm:$0xff]  }
 0x172   : > { %v5670_v22 = vld [vmem:[%s7761_s3 + $0x1e4] ss:$12 sps:$4 sm:$0xff]   ;;  %v5673_v13 = vld [vmem:[%s7761_s3 + $0x1e0] ss:$12 sps:$4 sm:$0xff]   ;;  %v5679_v27 = vld [vmem:[%s7761_s3 + $0x1c8] ss:$12 sps:$4 sm:$0xff]  }
 0x173   : > { %4171 = vmatpush1.bf16.msra.mxu0 %v5660_v15  ;;  %v5674_v24 = vld [vmem:[%s7761_s3 + $0x4c] ss:$12 sps:$4 sm:$0xff]   ;;  %v5680_v28 = vld [vmem:[%s7761_s3 + $0x34] ss:$12 sps:$4 sm:$0xff]   ;;  %v5684_v30 = vld [vmem:[%s7761_s3 + $0x30] ss:$12 sps:$4 sm:$0xff]  }
 0x174   : > { %4212 = vmatpush1.bf16.msra.mxu1 %v5661_v16  ;;  %4172 = vmatprep.subr.bf16.mxu0 %v5662_v17  ;;  %v5676_v25 = vld [vmem:[%s7761_s3 + $0x1cc] ss:$12 sps:$4 sm:$0xff]   ;;  %v5682_v29 = vld [vmem:[%s7761_s3 + $0x1b4] ss:$12 sps:$4 sm:$0xff]   ;;  %v5685_v31 = vld [vmem:[%s7761_s3 + $0x1b0] ss:$12 sps:$4 sm:$0xff]  }
 0x175   : > { %4213 = vmatprep.subr.bf16.mxu1 %v5664_v18  ;;  %v5686_v32 = vld [vmem:[%s7761_s3 + $0x1c] ss:$12 sps:$4 sm:$0xff]   ;;  %v5690_v34 = vld [vmem:[%s7761_s3 + $0x18] ss:$12 sps:$4 sm:$0xff]   ;;  %v5696_v38 = vld [vmem:[%s7761_s3] ss:$12 sps:$4 sm:$0xff]  }
 0x176   : > { %v5688_v33 = vld [vmem:[%s7761_s3 + $0x19c] ss:$12 sps:$4 sm:$0xff]   ;;  %v5691_v35 = vld [vmem:[%s7761_s3 + $0x198] ss:$12 sps:$4 sm:$0xff]   ;;  %v5697_v39 = vld [vmem:[%s7761_s3 + $0x180] ss:$12 sps:$4 sm:$0xff]  }
 0x177   : > { %4173 = vmatpush1.bf16.msra.mxu0 %v5666_v19  ;;  %v5692_v36 = vld [vmem:[%s7761_s3 + $0x4] ss:$12 sps:$4 sm:$0xff]   ;;  %v5698_v40 = vld [vmem:[%s7761_s3 + $0x16c] ss:$12 sps:$4 sm:$0xff]   ;;  %v5702_v42 = vld [vmem:[%s7761_s3 + $0x168] ss:$12 sps:$4 sm:$0xff]  }
 0x178   : > { %4214 = vmatpush1.bf16.msra.mxu1 %v5667_v20  ;;  %4174 = vmatprep.subr.bf16.mxu0 %v5668_v21  ;;  %v5694_v37 = vld [vmem:[%s7761_s3 + $0x184] ss:$12 sps:$4 sm:$0xff]   ;;  %v5700_v41 = vld [vmem:[%s7761_s3 + $0x2ec] ss:$12 sps:$4 sm:$0xff]   ;;  %v5703_v9 = vld [vmem:[%s7761_s3 + $0x2e8] ss:$12 sps:$4 sm:$0xff]  }
 0x179   : > { %4215 = vmatprep.subr.bf16.mxu1 %v5670_v22  ;;  %v5704_v43 = vld [vmem:[%s7761_s3 + $0x154] ss:$12 sps:$4 sm:$0xff]   ;;  %v5708_v46 = vld [vmem:[%s7761_s3 + $0x150] ss:$12 sps:$4 sm:$0xff]   ;;  %v6556_v49 = vshrl.u32 %v1463_v44, 7 }
 0x17a   : > { %v5706_v45 = vld [vmem:[%s7761_s3 + $0x2d4] ss:$12 sps:$4 sm:$0xff]   ;;  %v5709_v47 = vld [vmem:[%s7761_s3 + $0x2d0] ss:$12 sps:$4 sm:$0xff]   ;;  %v5714_v51 = vld [vmem:[%s7761_s3 + $0x138] ss:$12 sps:$4 sm:$0xff]  }
 0x17b   : > { %4175 = vmatpush1.bf16.msra.mxu0 %v5672_v23  ;;  %v5710_v48 = vld [vmem:[%s7761_s3 + $0x13c] ss:$12 sps:$4 sm:$0xff]   ;;  %v5715_v52 = vld [vmem:[%s7761_s3 + $0x2b8] ss:$12 sps:$4 sm:$0xff]   ;;  %v6571_v54 = vsub.s32 1, %v6556_v49  ;;  %v1477_v55 = vsub.s32 3, %v6556_v49 }
 0x17c   : > { %4216 = vmatpush1.bf16.msra.mxu1 %v5673_v13  ;;  %4176 = vmatprep.subr.bf16.mxu0 %v5674_v24  ;;  %v5712_v50 = vld [vmem:[%s7761_s3 + $0x2bc] ss:$12 sps:$4 sm:$0xff]   ;;  %v5716_v53 = vld [vmem:[%s7761_s3 + $0x124] ss:$12 sps:$4 sm:$0xff]   ;;  %v5720_v57 = vld [vmem:[%s7761_s3 + $0x120] ss:$12 sps:$4 sm:$0xff]  }
 0x17d   : > { %4217 = vmatprep.subr.bf16.mxu1 %v5676_v25  ;;  %v5718_v56 = vld [vmem:[%s7761_s3 + $0x2a4] ss:$12 sps:$4 sm:$0xff]   ;;  %v1446_v60 = vld [vmem:[#allocation2 + $0x18] sm:$0xff]  ;;  %v5721_v61 = vld [vmem:[%s7761_s3 + $0x2a0] ss:$12 sps:$4 sm:$0xff]   ;;  %v6603_v5 = vsub.s32 0, %v6556_v49 }
 0x17e   : > { %v1444_v58 = vld [vmem:[#allocation2] sm:$0xff]  ;;  %v5722_v0 = vld [vmem:[%s7761_s3 + $0x10c] ss:$12 sps:$4 sm:$0xff]   ;;  %v5726_v4 = vld [vmem:[%s7761_s3 + $0x108] ss:$12 sps:$4 sm:$0xff]   ;;  %v6606_v6 = vsub.s32 2, %v6556_v49 }
 0x17f   : > { %4177 = vmatpush1.bf16.msra.mxu0 %v5678_v26  ;;  %v6583_v59 = vld [vmem:[%s7760_s2] sm:$0xff]  ;;  %v5724_v1 = vld [vmem:[%s7761_s3 + $0x28c] ss:$12 sps:$4 sm:$0xff]   ;;  %v5727_v7 = vld [vmem:[%s7761_s3 + $0x288] ss:$12 sps:$4 sm:$0xff]  }
 0x180   : > { %4218 = vmatpush1.bf16.msra.mxu1 %v5679_v27  ;;  %4178 = vmatprep.subr.bf16.mxu0 %v5680_v28  ;;  %v1470_v62 = vrot.slane %v6583_v59, %v6571_v54  ;;  %v1478_v63 = vrot.slane %v6583_v59, %v1477_v55  ;;  %v5728_v11 = vld [vmem:[%s7761_s3 + $0xf4] ss:$12 sps:$4 sm:$0xff]   ;;  %v5732_v14 = vld [vmem:[%s7761_s3 + $0xf0] ss:$12 sps:$4 sm:$0xff]   ;;  %v1466_v18 = vrot.slane %v6583_v59, %v6603_v5  ;;  %v5738_v25 = vld [vmem:[%s7761_s3 + $0xd8] ss:$12 sps:$4 sm:$0xff]  }
 0x181   : > { %4219 = vmatprep.subr.bf16.mxu1 %v5682_v29  ;;  %v5730_v12 = vld [vmem:[%s7761_s3 + $0x274] ss:$12 sps:$4 sm:$0xff]   ;;  %v5733_v17 = vld [vmem:[%s7761_s3 + $0x270] ss:$12 sps:$4 sm:$0xff]   ;;  %v1474_v19 = vrot.slane %v6583_v59, %v6606_v6  ;;  %v5739_v26 = vld [vmem:[%s7761_s3 + $0x258] ss:$12 sps:$4 sm:$0xff]  }
 0x182   : > { %v1544_v2 = vadd.f32 %v1470_v62, %v1444_v58  ;;  %v1546_v3 = vadd.f32 %v1478_v63, %v1446_v60  ;;  %v1443_v20 = vld [vmem:[#allocation2 + $0x30] sm:$0xff]  ;;  %v1445_v21 = vld [vmem:[#allocation2 + $0x58] sm:$0xff]  ;;  %v1493_v58 = vsub.s32 7, %v6556_v49 }
 0x183   : > { %4179 = vmatpush1.bf16.msra.mxu0 %v5684_v30  ;;  %v5734_v22 = vld [vmem:[%s7761_s3 + $0xdc] ss:$12 sps:$4 sm:$0xff]   ;;  %v1543_v13 = vadd.f32 %v1466_v18, %v1443_v20  ;;  %v1545_v24 = vadd.f32 %v1474_v19, %v1445_v21  ;;  %v5740_v27 = vld [vmem:[%s7761_s3 + $0xc4] ss:$12 sps:$4 sm:$0xff]   ;;  %v5778_v60 = vld [vmem:[%s7761_s3 + $0x334] ss:$12 sps:$4 sm:$0xff]  }
 0x184   : > { %4220 = vmatpush1.bf16.msra.mxu1 %v5685_v31  ;;  %4180 = vmatprep.subr.bf16.mxu0 %v5686_v32  ;;  %v1560_v8 = vmax.f32 %v1544_v2, 0.0  ;;  %v1562_v10 = vmax.f32 %v1546_v3, 0.0  ;;  %v5736_v23 = vld [vmem:[%s7761_s3 + $0x25c] ss:$12 sps:$4 sm:$0xff]   ;;  %v5742_v28 = vld [vmem:[%s7761_s3 + $0x244] ss:$12 sps:$4 sm:$0xff]  }
 0x185   : > { %4221 = vmatprep.subr.bf16.mxu1 %v5688_v33  ;;  %v1559_v29 = vmax.f32 %v1543_v13, 0.0  ;;  %v1561_v30 = vmax.f32 %v1545_v24, 0.0  ;;  %v5744_v31 = vld [vmem:[%s7761_s3 + $0xc0] ss:$12 sps:$4 sm:$0xff]   ;;  %v5758_v44 = vld [vmem:[%s7761_s3 + $0x378] ss:$12 sps:$4 sm:$0xff]  }
 0x186   : > { %v6620_v15 = vpack.c.bf16 %v1560_v8, %v1560_v8  ;;  %v6622_v16 = vpack.c.bf16 %v1562_v10, %v1562_v10  ;;  %v5745_v32 = vld [vmem:[%s7761_s3 + $0x240] ss:$12 sps:$4 sm:$0xff]   ;;  %v5776_v62 = vld [vmem:[%s7761_s3 + $0x330] ss:$12 sps:$4 sm:$0xff]   ;;  %v5782_v8 = vld [vmem:[%s7761_s3 + $0x318] ss:$12 sps:$4 sm:$0xff]  }
 0x187   : > { %4181 = vmatpush1.bf16.msra.mxu0 %v5690_v34  ;;  %v5748_v33 = vld [vmem:[%s7761_s3 + $0x3ac] ss:$12 sps:$4 sm:$0xff]   ;;  %v5779_v63 = vld [vmem:[%s7761_s3 + $0x4b0] ss:$12 sps:$4 sm:$0xff]  }
 0x188   : > { %4222 = vmatpush1.bf16.msra.mxu1 %v5691_v35  ;;  %4182 = vmatprep.subr.bf16.mxu0 %v5692_v36  ;;  %v5751_v34 = vld [vmem:[%s7761_s3 + $0x52c] ss:$12 sps:$4 sm:$0xff]   ;;  %v6663_v35 = vpack.c.bf16 %v1559_v29, %v1559_v29  ;;  %v6665_v36 = vpack.c.bf16 %v1561_v30, %v1561_v30  ;;  %v5784_v2 = vld [vmem:[%s7761_s3 + $0x31c] ss:$12 sps:$4 sm:$0xff]  }
 0x189   : > { %4223 = vmatprep.subr.bf16.mxu1 %v5694_v37  ;;  %4200 = vmatprep.mubr.bf16.mxu0 %v6620_v15  ;;  %v5746_v37 = vld [vmem:[%s7761_s3 + $0x3a8] ss:$12 sps:$4 sm:$0xff]   ;;  %v5785_v10 = vld [vmem:[%s7761_s3 + $0x498] ss:$12 sps:$4 sm:$0xff]   ;;  %v5788_v20 = vld [vmem:[%s7761_s3 + $0x300] ss:$12 sps:$4 sm:$0xff]  }
 0x18a   : > { %4241 = vmatprep.mubr.bf16.mxu1 %v6622_v16  ;;  %v5787_v3 = vld [vmem:[%s7761_s3 + $0x49c] ss:$12 sps:$4 sm:$0xff]   ;;  %v5791_v21 = vld [vmem:[%s7761_s3 + $0x480] ss:$12 sps:$4 sm:$0xff]  }
 0x18b   : > { %4183 = vmatpush1.bf16.msra.mxu0 %v5696_v38  ;;  %v5749_v38 = vld [vmem:[%s7761_s3 + $0x528] ss:$12 sps:$4 sm:$0xff]   ;;  %v5796_v13 = vld [vmem:[%s7761_s3 + $0x46c] ss:$12 sps:$4 sm:$0xff]   ;;  %v5800_v29 = vld [vmem:[%s7761_s3 + $0x450] ss:$12 sps:$4 sm:$0xff]  }
 0x18c   : > { %4224 = vmatpush1.bf16.msra.mxu1 %v5697_v39  ;;  %4184 = vmatprep.subr.bf16.mxu0 %v5698_v40  ;;  %v5754_v39 = vld [vmem:[%s7761_s3 + $0x394] ss:$12 sps:$4 sm:$0xff]   ;;  %v5799_v24 = vld [vmem:[%s7761_s3 + $0x5ec] ss:$12 sps:$4 sm:$0xff]   ;;  %v5803_v30 = vld [vmem:[%s7761_s3 + $0x5d0] ss:$12 sps:$4 sm:$0xff]  }
 0x18d   : > { %4225 = vmatprep.subr.bf16.mxu1 %v5700_v41  ;;  %v5757_v40 = vld [vmem:[%s7761_s3 + $0x514] ss:$12 sps:$4 sm:$0xff]   ;;  %v5752_v41 = vld [vmem:[%s7761_s3 + $0x390] ss:$12 sps:$4 sm:$0xff]  }
 0x18f   : > { %4185 = vmatpush2.bf16.msra.mxu0 %v5702_v42  ;;  %v5755_v42 = vld [vmem:[%s7761_s3 + $0x510] ss:$12 sps:$4 sm:$0xff]  }
 0x190   : > { %4226 = vmatpush2.bf16.msra.mxu1 %v5703_v9  ;;  %4186 = vmatprep.subr.bf16.mxu0 %v5704_v43  ;;  %v5760_v9 = vld [vmem:[%s7761_s3 + $0x37c] ss:$12 sps:$4 sm:$0xff]  }
 0x191   : > { %4227 = vmatprep.subr.bf16.mxu1 %v5706_v45  ;;  %v5763_v43 = vld [vmem:[%s7761_s3 + $0x4fc] ss:$12 sps:$4 sm:$0xff]   ;;  %v5761_v45 = vld [vmem:[%s7761_s3 + $0x4f8] ss:$12 sps:$4 sm:$0xff]  }
 0x193   : > { %4187 = vmatpush2.bf16.msra.mxu0 %v5708_v46  ;;  %v5766_v46 = vld [vmem:[%s7761_s3 + $0x364] ss:$12 sps:$4 sm:$0xff]  }
 0x194   : > { %4228 = vmatpush2.bf16.msra.mxu1 %v5709_v47  ;;  %4188 = vmatprep.subr.bf16.mxu0 %v5710_v48  ;;  %v5769_v47 = vld [vmem:[%s7761_s3 + $0x4e4] ss:$12 sps:$4 sm:$0xff]   ;;  %v5764_v48 = vld [vmem:[%s7761_s3 + $0x360] ss:$12 sps:$4 sm:$0xff]  }
 0x195   : > { %4229 = vmatprep.subr.bf16.mxu1 %v5712_v50  ;;  %v5767_v50 = vld [vmem:[%s7761_s3 + $0x4e0] ss:$12 sps:$4 sm:$0xff]  }
 0x197   : > { %4189 = vmatpush2.bf16.msra.mxu0 %v5714_v51  ;;  %v5772_v51 = vld [vmem:[%s7761_s3 + $0x34c] ss:$12 sps:$4 sm:$0xff]  }
 0x198   : > { %4230 = vmatpush2.bf16.msra.mxu1 %v5715_v52  ;;  %4190 = vmatprep.subr.bf16.mxu0 %v5716_v53  ;;  %v5775_v52 = vld [vmem:[%s7761_s3 + $0x4cc] ss:$12 sps:$4 sm:$0xff]   ;;  %v1485_v53 = vsub.s32 5, %v6556_v49 }
 0x199   : > { %4231 = vmatprep.subr.bf16.mxu1 %v5718_v56  ;;  %v5770_v56 = vld [vmem:[%s7761_s3 + $0x348] ss:$12 sps:$4 sm:$0xff]  }
 0x19b   : > { %4191 = vmatpush2.bf16.msra.mxu0 %v5720_v57  ;;  %v5773_v57 = vld [vmem:[%s7761_s3 + $0x4c8] ss:$12 sps:$4 sm:$0xff]  }
 0x19c   : > { %4232 = vmatpush2.bf16.msra.mxu1 %v5721_v61  ;;  %4192 = vmatprep.subr.bf16.mxu0 %v5722_v0  ;;  %v5781_v61 = vld [vmem:[%s7761_s3 + $0x4b4] ss:$12 sps:$4 sm:$0xff]   ;;  %v1486_v0 = vrot.slane %v6583_v59, %v1485_v53 }
 0x19d   : > { %4233 = vmatprep.subr.bf16.mxu1 %v5724_v1  ;;  %v1494_v1 = vrot.slane %v6583_v59, %v1493_v58 }
 0x19f   : > { %4193 = vmatpush2.bf16.msra.mxu0 %v5726_v4  ;;  %v1448_v4 = vld [vmem:[#allocation2 + $0x68] sm:$0xff] }
 0x1a0   : > { %4234 = vmatpush2.bf16.msra.mxu1 %v5727_v7  ;;  %4194 = vmatprep.subr.bf16.mxu0 %v5728_v11  ;;  %v1450_v7 = vld [vmem:[#allocation2 + $0x48] sm:$0xff]  ;;  %v1548_v11 = vadd.f32 %v1486_v0, %v1448_v4  ;;  %v5833_v0 = vld [vmem:[%s7761_s3 + $0x558] ss:$12 sps:$4 sm:$0xff]  }
 0x1a1   : > { %4235 = vmatprep.subr.bf16.mxu1 %v5730_v12  ;;  %v1550_v12 = vadd.f32 %v1494_v1, %v1450_v7  ;;  %v5838_v1 = vld [vmem:[%s7761_s3 + $0x3c4] ss:$12 sps:$4 sm:$0xff]   ;;  %v5836_v7 = vld [vmem:[%s7761_s3 + $0x3c0] ss:$12 sps:$4 sm:$0xff]  }
 0x1a2   : > { %v1564_v18 = vmax.f32 %v1548_v11, 0.0  ;;  %v5847_v11 = vld [vmem:[%s7761_s3 + $0x82c] ss:$12 sps:$4 sm:$0xff]  }
 0x1a3   : > { %4195 = vmatpush2.bf16.msra.mxu0 %v5732_v14  ;;  %v5790_v14 = vld [vmem:[%s7761_s3 + $0x304] ss:$12 sps:$4 sm:$0xff]   ;;  %v1566_v19 = vmax.f32 %v1550_v12, 0.0 }
 0x1a4   : > { %4236 = vmatpush2.bf16.msra.mxu1 %v5733_v17  ;;  %4196 = vmatprep.subr.bf16.mxu0 %v5734_v22  ;;  %v5793_v17 = vld [vmem:[%s7761_s3 + $0x484] ss:$12 sps:$4 sm:$0xff]   ;;  %v6767_v22 = vpack.c.bf16 %v1564_v18, %v1564_v18  ;;  %v5845_v18 = vld [vmem:[%s7761_s3 + $0x828] ss:$12 sps:$4 sm:$0xff]  }
 0x1a5   : > { %4237 = vmatprep.subr.bf16.mxu1 %v5736_v23  ;;  %v6769_v23 = vpack.c.bf16 %v1566_v19, %v1566_v19  ;;  %v5850_v19 = vld [vmem:[%s7761_s3 + $0x694] ss:$12 sps:$4 sm:$0xff]  }
 0x1a7   : > { %4197 = vmatpush2.bf16.msra.mxu0 %v5738_v25  ;;  %v5794_v25 = vld [vmem:[%s7761_s3 + $0x468] ss:$12 sps:$4 sm:$0xff]  }
 0x1a8   : > { %4238 = vmatpush2.bf16.msra.mxu1 %v5739_v26  ;;  %4198 = vmatprep.subr.bf16.mxu0 %v5740_v27  ;;  %v5797_v26 = vld [vmem:[%s7761_s3 + $0x5e8] ss:$12 sps:$4 sm:$0xff]  }
 0x1a9   : > { %4239 = vmatprep.subr.bf16.mxu1 %v5742_v28  ;;  %v5802_v27 = vld [vmem:[%s7761_s3 + $0x454] ss:$12 sps:$4 sm:$0xff]  }
 0x1aa   : > { %v5805_v28 = vld [vmem:[%s7761_s3 + $0x5d4] ss:$12 sps:$4 sm:$0xff]  }
 0x1ab   : > { %4199 = vmatpush2.bf16.msra.mxu0 %v5744_v31  ;;  %v5808_v31 = vld [vmem:[%s7761_s3 + $0x43c] ss:$12 sps:$4 sm:$0xff]  }
 0x1ac   : > { %4240 = vmatpush2.bf16.msra.mxu1 %v5745_v32  ;;  %4250 = vmatprep.subr.bf16.mxu0 %v5748_v33  ;;  %v5811_v32 = vld [vmem:[%s7761_s3 + $0x5bc] ss:$12 sps:$4 sm:$0xff]   ;;  %v5806_v33 = vld [vmem:[%s7761_s3 + $0x438] ss:$12 sps:$4 sm:$0xff]  }
 0x1ad   : > { %4291 = vmatprep.subr.bf16.mxu1 %v5751_v34  ;;  %v5809_v34 = vld [vmem:[%s7761_s3 + $0x5b8] ss:$12 sps:$4 sm:$0xff]  }
 0x1ae   : > { %4201 = vmatmul.mubr.bf16.vlgmr.msra.gmra.mxu0 %v6663_v35 }
 0x1af   : > { %4242 = vmatmul.mubr.bf16.vlgmr.msra.gmra.mxu1 %v6665_v36  ;;  %4251 = vmatpush1.bf16.msra.mxu0 %v5746_v37  ;;  %v5814_v37 = vld [vmem:[%s7761_s3 + $0x424] ss:$12 sps:$4 sm:$0xff]  }
 0x1b0   : > { %4292 = vmatpush1.bf16.msra.mxu1 %v5749_v38  ;;  %4252 = vmatprep.subr.bf16.mxu0 %v5754_v39  ;;  %v5817_v38 = vld [vmem:[%s7761_s3 + $0x5a4] ss:$12 sps:$4 sm:$0xff]   ;;  %v5812_v39 = vld [vmem:[%s7761_s3 + $0x420] ss:$12 sps:$4 sm:$0xff]  }
 0x1b1   : > { %4293 = vmatprep.subr.bf16.mxu1 %v5757_v40  ;;  %4282 = vmatprep.mubr.bf16.mxu0 %v6767_v22  ;;  %v5815_v40 = vld [vmem:[%s7761_s3 + $0x5a0] ss:$12 sps:$4 sm:$0xff]  }
 0x1b2   : > { %4323 = vmatprep.mubr.bf16.mxu1 %v6769_v23 }
 0x1b3   : > { %4253 = vmatpush1.bf16.msra.mxu0 %v5752_v41  ;;  %v5820_v41 = vld [vmem:[%s7761_s3 + $0x40c] ss:$12 sps:$4 sm:$0xff]  }
 0x1b4   : > { %4294 = vmatpush1.bf16.msra.mxu1 %v5755_v42  ;;  %4254 = vmatprep.subr.bf16.mxu0 %v5760_v9  ;;  %v5823_v42 = vld [vmem:[%s7761_s3 + $0x58c] ss:$12 sps:$4 sm:$0xff]   ;;  %v1481_v9 = vsub.s32 4, %v6556_v49 }
 0x1b5   : > { %4295 = vmatprep.subr.bf16.mxu1 %v5763_v43  ;;  %v1489_v43 = vsub.s32 6, %v6556_v49 }
 0x1b7   : > { %4255 = vmatpush1.bf16.msra.mxu0 %v5758_v44  ;;  %v5818_v44 = vld [vmem:[%s7761_s3 + $0x408] ss:$12 sps:$4 sm:$0xff]  }
 0x1b8   : > { %4296 = vmatpush1.bf16.msra.mxu1 %v5761_v45  ;;  %4256 = vmatprep.subr.bf16.mxu0 %v5766_v46  ;;  %v5821_v45 = vld [vmem:[%s7761_s3 + $0x588] ss:$12 sps:$4 sm:$0xff]  }
 0x1b9   : > { %4297 = vmatprep.subr.bf16.mxu1 %v5769_v47  ;;  %v5826_v46 = vld [vmem:[%s7761_s3 + $0x3f4] ss:$12 sps:$4 sm:$0xff]  }
 0x1ba   : > { %v5829_v47 = vld [vmem:[%s7761_s3 + $0x574] ss:$12 sps:$4 sm:$0xff]  }
 0x1bb   : > { %4257 = vmatpush1.bf16.msra.mxu0 %v5764_v48  ;;  %v5824_v48 = vld [vmem:[%s7761_s3 + $0x3f0] ss:$12 sps:$4 sm:$0xff]  }
 0x1bc   : > { %4298 = vmatpush1.bf16.msra.mxu1 %v5767_v50  ;;  %4258 = vmatprep.subr.bf16.mxu0 %v5772_v51  ;;  %v5827_v50 = vld [vmem:[%s7761_s3 + $0x570] ss:$12 sps:$4 sm:$0xff]   ;;  %v1482_v51 = vrot.slane %v6583_v59, %v1481_v9 }
 0x1bd   : > { %4299 = vmatprep.subr.bf16.mxu1 %v5775_v52  ;;  %v1490_v52 = vrot.slane %v6583_v59, %v1489_v43  ;;  %v5830_v59 = vld [vmem:[%s7761_s3 + $0x3d8] ss:$12 sps:$4 sm:$0xff]  }
 0x1bf   : > { %4259 = vmatpush1.bf16.msra.mxu0 %v5770_v56  ;;  %v1447_v56 = vld [vmem:[#allocation2 + $0x50] sm:$0xff] }
 0x1c0   : > { %4300 = vmatpush1.bf16.msra.mxu1 %v5773_v57  ;;  %4260 = vmatprep.subr.bf16.mxu0 %v5778_v60  ;;  %v1449_v57 = vld [vmem:[#allocation2 + $0x8] sm:$0xff] }
 0x1c1   : > { %4301 = vmatprep.subr.bf16.mxu1 %v5781_v61  ;;  %v5832_v60 = vld [vmem:[%s7761_s3 + $0x3dc] ss:$12 sps:$4 sm:$0xff]  }
 0x1c2   : > { %v5835_v61 = vld [vmem:[%s7761_s3 + $0x55c] ss:$12 sps:$4 sm:$0xff]  }
 0x1c3   : > { %4261 = vmatpush1.bf16.msra.mxu0 %v5776_v62  ;;  %v1547_v62 = vadd.f32 %v1482_v51, %v1447_v56  ;;  %v5877_v51 = vld [vmem:[%s7761_s3 + $0x7b4] ss:$12 sps:$4 sm:$0xff]   ;;  %v5875_v56 = vld [vmem:[%s7761_s3 + $0x7b0] ss:$12 sps:$4 sm:$0xff]  }
 0x1c4   : > { %4302 = vmatpush1.bf16.msra.mxu1 %v5779_v63  ;;  %4262 = vmatprep.subr.bf16.mxu0 %v5784_v2  ;;  %v1549_v63 = vadd.f32 %v1490_v52, %v1449_v57  ;;  %v5841_v2 = vld [vmem:[%s7761_s3 + $0x544] ss:$12 sps:$4 sm:$0xff]   ;;  %v5880_v57 = vld [vmem:[%s7761_s3 + $0x61c] ss:$12 sps:$4 sm:$0xff]  }
 0x1c5   : > { %4303 = vmatprep.subr.bf16.mxu1 %v5787_v3  ;;  %v1563_v3 = vmax.f32 %v1547_v62, 0.0  ;;  %v5872_v52 = vld [vmem:[%s7761_s3 + $0x630] ss:$12 sps:$4 sm:$0xff]   ;;  %v5881_v62 = vld [vmem:[%s7761_s3 + $0x798] ss:$12 sps:$4 sm:$0xff]  }
 0x1c6   : > { %v1565_v4 = vmax.f32 %v1549_v63, 0.0  ;;  %v5886_v63 = vld [vmem:[%s7761_s3 + $0x604] ss:$12 sps:$4 sm:$0xff]  }
 0x1c7   : > { %4263 = vmatpush1.bf16.msra.mxu0 %v5782_v8  ;;  %v5839_v8 = vld [vmem:[%s7761_s3 + $0x540] ss:$12 sps:$4 sm:$0xff]   ;;  %v6883_v12 = vpack.c.bf16 %v1563_v3, %v1563_v3 }
 0x1c8   : > { %4304 = vmatpush1.bf16.msra.mxu1 %v5785_v10  ;;  %4264 = vmatprep.subr.bf16.mxu0 %v5790_v14  ;;  %v5844_v10 = vld [vmem:[%s7761_s3 + $0x6ac] ss:$12 sps:$4 sm:$0xff]   ;;  %v6885_v14 = vpack.c.bf16 %v1565_v4, %v1565_v4  ;;  %v5890_v4 = vld [vmem:[%s7761_s3 + $0x768] ss:$12 sps:$4 sm:$0xff]  }
 0x1c9   : > { %4305 = vmatprep.subr.bf16.mxu1 %v5793_v17  ;;  %v5842_v17 = vld [vmem:[%s7761_s3 + $0x6a8] ss:$12 sps:$4 sm:$0xff]   ;;  %v5895_v3 = vld [vmem:[%s7761_s3 + $0x8ec] ss:$12 sps:$4 sm:$0xff]  }
 0x1cb   : > { %4265 = vmatpush1.bf16.msra.mxu0 %v5788_v20  ;;  %v5853_v20 = vld [vmem:[%s7761_s3 + $0x814] ss:$12 sps:$4 sm:$0xff]  }
 0x1cc   : > { %4306 = vmatpush1.bf16.msra.mxu1 %v5791_v21  ;;  %4266 = vmatprep.subr.bf16.mxu0 %v5796_v13  ;;  %v5848_v21 = vld [vmem:[%s7761_s3 + $0x690] ss:$12 sps:$4 sm:$0xff]   ;;  %v1452_v13 = vld [vmem:[#allocation2 + $0x20] sm:$0xff] }
 0x1cd   : > { %4307 = vmatprep.subr.bf16.mxu1 %v5799_v24  ;;  %v6907_v24 = vld [vmem:[%s7760_s2 + $0x8] sm:$0xff] }
 0x1cf   : > { %4267 = vmatpush2.bf16.msra.mxu0 %v5794_v25  ;;  %v5851_v25 = vld [vmem:[%s7761_s3 + $0x810] ss:$12 sps:$4 sm:$0xff]  }
 0x1d0   : > { %4308 = vmatpush2.bf16.msra.mxu1 %v5797_v26  ;;  %4268 = vmatprep.subr.bf16.mxu0 %v5802_v27  ;;  %v5856_v26 = vld [vmem:[%s7761_s3 + $0x67c] ss:$12 sps:$4 sm:$0xff]   ;;  %v1502_v27 = vrot.slane %v6907_v24, %v6571_v54 }
 0x1d1   : > { %4309 = vmatprep.subr.bf16.mxu1 %v5805_v28  ;;  %v1454_v28 = vld [vmem:[#allocation2 + $0x38] sm:$0xff] }
 0x1d3   : > { %4269 = vmatpush2.bf16.msra.mxu0 %v5800_v29  ;;  %v1510_v29 = vrot.slane %v6907_v24, %v1477_v55  ;;  %v5862_v55 = vld [vmem:[%s7761_s3 + $0x664] ss:$12 sps:$4 sm:$0xff]  }
 0x1d4   : > { %4310 = vmatpush2.bf16.msra.mxu1 %v5803_v30  ;;  %4270 = vmatprep.subr.bf16.mxu0 %v5808_v31  ;;  %v5859_v30 = vld [vmem:[%s7761_s3 + $0x7fc] ss:$12 sps:$4 sm:$0xff]   ;;  %v1552_v31 = vadd.f32 %v1502_v27, %v1452_v13  ;;  %v5910_v13 = vld [vmem:[%s7761_s3 + $0x724] ss:$12 sps:$4 sm:$0xff]   ;;  %v5911_v27 = vld [vmem:[%s7761_s3 + $0x8a0] ss:$12 sps:$4 sm:$0xff]  }
 0x1d5   : > { %4311 = vmatprep.subr.bf16.mxu1 %v5811_v32  ;;  %v1554_v32 = vadd.f32 %v1510_v29, %v1454_v28  ;;  %v5916_v28 = vld [vmem:[%s7761_s3 + $0x70c] ss:$12 sps:$4 sm:$0xff]  }
 0x1d6   : > { %v5919_v29 = vld [vmem:[%s7761_s3 + $0x88c] ss:$12 sps:$4 sm:$0xff]  }
 0x1d7   : > { %4271 = vmatpush2.bf16.msra.mxu0 %v5806_v33  ;;  %v5854_v33 = vld [vmem:[%s7761_s3 + $0x678] ss:$12 sps:$4 sm:$0xff]  }
 0x1d8   : > { %4312 = vmatpush2.bf16.msra.mxu1 %v5809_v34  ;;  %4272 = vmatprep.subr.bf16.mxu0 %v5814_v37  ;;  %v5857_v34 = vld [vmem:[%s7761_s3 + $0x7f8] ss:$12 sps:$4 sm:$0xff]   ;;  %v1568_v37 = vmax.f32 %v1552_v31, 0.0  ;;  %v5917_v31 = vld [vmem:[%s7761_s3 + $0x888] ss:$12 sps:$4 sm:$0xff]  }
 0x1d9   : > { %4313 = vmatprep.subr.bf16.mxu1 %v5817_v38  ;;  %v1570_v38 = vmax.f32 %v1554_v32, 0.0  ;;  %v5922_v32 = vld [vmem:[%s7761_s3 + $0x6f4] ss:$12 sps:$4 sm:$0xff]  }
 0x1db   : > { %4273 = vmatpush2.bf16.msra.mxu0 %v5812_v39  ;;  %v5865_v39 = vld [vmem:[%s7761_s3 + $0x7e4] ss:$12 sps:$4 sm:$0xff]  }
 0x1dc   : > { %4314 = vmatpush2.bf16.msra.mxu1 %v5815_v40  ;;  %4274 = vmatprep.subr.bf16.mxu0 %v5820_v41  ;;  %v6935_v40 = vpack.c.bf16 %v1568_v37, %v1568_v37  ;;  %v6937_v41 = vpack.c.bf16 %v1570_v38, %v1570_v38  ;;  %v5928_v37 = vld [vmem:[%s7761_s3 + $0x6dc] ss:$12 sps:$4 sm:$0xff]   ;;  %v1451_v38 = vld [vmem:[#allocation2 + $0x40] sm:$0xff] }
 0x1dd   : > { %4315 = vmatprep.subr.bf16.mxu1 %v5823_v42  ;;  %v5860_v42 = vld [vmem:[%s7761_s3 + $0x660] ss:$12 sps:$4 sm:$0xff]  }
 0x1df   : > { %4275 = vmatpush2.bf16.msra.mxu0 %v5818_v44  ;;  %v5863_v44 = vld [vmem:[%s7761_s3 + $0x7e0] ss:$12 sps:$4 sm:$0xff]  }
 0x1e0   : > { %4316 = vmatpush2.bf16.msra.mxu1 %v5821_v45  ;;  %4276 = vmatprep.subr.bf16.mxu0 %v5826_v46  ;;  %v5868_v45 = vld [vmem:[%s7761_s3 + $0x64c] ss:$12 sps:$4 sm:$0xff]  }
 0x1e1   : > { %4317 = vmatprep.subr.bf16.mxu1 %v5829_v47  ;;  %v5871_v46 = vld [vmem:[%s7761_s3 + $0x7cc] ss:$12 sps:$4 sm:$0xff]   ;;  %v5866_v47 = vld [vmem:[%s7761_s3 + $0x648] ss:$12 sps:$4 sm:$0xff]  }
 0x1e3   : > { %4277 = vmatpush2.bf16.msra.mxu0 %v5824_v48  ;;  %v5869_v48 = vld [vmem:[%s7761_s3 + $0x7c8] ss:$12 sps:$4 sm:$0xff]  }
 0x1e4   : > { %4318 = vmatpush2.bf16.msra.mxu1 %v5827_v50  ;;  %4278 = vmatprep.subr.bf16.mxu0 %v5832_v60  ;;  %v5874_v50 = vld [vmem:[%s7761_s3 + $0x634] ss:$12 sps:$4 sm:$0xff]   ;;  %v5883_v60 = vld [vmem:[%s7761_s3 + $0x79c] ss:$12 sps:$4 sm:$0xff]  }
 0x1e5   : > { %4319 = vmatprep.subr.bf16.mxu1 %v5835_v61  ;;  %v5878_v61 = vld [vmem:[%s7761_s3 + $0x618] ss:$12 sps:$4 sm:$0xff]  }
 0x1e7   : > { %4279 = vmatpush2.bf16.msra.mxu0 %v5830_v59  ;;  %v5889_v59 = vld [vmem:[%s7761_s3 + $0x784] ss:$12 sps:$4 sm:$0xff]  }
 0x1e8   : > { %4320 = vmatpush2.bf16.msra.mxu1 %v5833_v0  ;;  %4280 = vmatprep.subr.bf16.mxu0 %v5838_v1  ;;  %v5884_v0 = vld [vmem:[%s7761_s3 + $0x600] ss:$12 sps:$4 sm:$0xff]  }
 0x1e9   : > { %4321 = vmatprep.subr.bf16.mxu1 %v5841_v2  ;;  %v5887_v1 = vld [vmem:[%s7761_s3 + $0x780] ss:$12 sps:$4 sm:$0xff]  }
 0x1ea   : > { %v5892_v2 = vld [vmem:[%s7761_s3 + $0x76c] ss:$12 sps:$4 sm:$0xff]  }
 0x1eb   : > { %4281 = vmatpush2.bf16.msra.mxu0 %v5836_v7  ;;  %v5893_v7 = vld [vmem:[%s7761_s3 + $0x8e8] ss:$12 sps:$4 sm:$0xff]  }
 0x1ec   : > { %4322 = vmatpush2.bf16.msra.mxu1 %v5839_v8  ;;  %4332 = vmatprep.subr.bf16.mxu0 %v5844_v10  ;;  %v5898_v8 = vld [vmem:[%s7761_s3 + $0x754] ss:$12 sps:$4 sm:$0xff]  }
 0x1ed   : > { %4373 = vmatprep.subr.bf16.mxu1 %v5847_v11  ;;  %v5901_v10 = vld [vmem:[%s7761_s3 + $0x8d4] ss:$12 sps:$4 sm:$0xff]   ;;  %v5896_v11 = vld [vmem:[%s7761_s3 + $0x750] ss:$12 sps:$4 sm:$0xff]  }
 0x1ee   : > { %4283 = vmatmul.mubr.bf16.vlgmr.msra.gmra.mxu0 %v6883_v12 }
 0x1ef   : > { %4324 = vmatmul.mubr.bf16.vlgmr.msra.gmra.mxu1 %v6885_v14  ;;  %4333 = vmatpush1.bf16.msra.mxu0 %v5842_v17  ;;  %v5899_v17 = vld [vmem:[%s7761_s3 + $0x8d0] ss:$12 sps:$4 sm:$0xff]  }
 0x1f0   : > { %4374 = vmatpush1.bf16.msra.mxu1 %v5845_v18  ;;  %4334 = vmatprep.subr.bf16.mxu0 %v5850_v19  ;;  %v5904_v18 = vld [vmem:[%s7761_s3 + $0x73c] ss:$12 sps:$4 sm:$0xff]  }
 0x1f1   : > { %4375 = vmatprep.subr.bf16.mxu1 %v5853_v20  ;;  %4364 = vmatprep.mubr.bf16.mxu0 %v6935_v40  ;;  %v5907_v19 = vld [vmem:[%s7761_s3 + $0x8bc] ss:$12 sps:$4 sm:$0xff]   ;;  %v5902_v20 = vld [vmem:[%s7761_s3 + $0x738] ss:$12 sps:$4 sm:$0xff]  }
 0x1f2   : > { %4405 = vmatprep.mubr.bf16.mxu1 %v6937_v41 }
 0x1f3   : > { %4335 = vmatpush1.bf16.msra.mxu0 %v5848_v21  ;;  %v5905_v21 = vld [vmem:[%s7761_s3 + $0x8b8] ss:$12 sps:$4 sm:$0xff]  }
 0x1f4   : > { %4376 = vmatpush1.bf16.msra.mxu1 %v5851_v25  ;;  %4336 = vmatprep.subr.bf16.mxu0 %v5856_v26  ;;  %v5913_v25 = vld [vmem:[%s7761_s3 + $0x8a4] ss:$12 sps:$4 sm:$0xff]   ;;  %v5908_v26 = vld [vmem:[%s7761_s3 + $0x720] ss:$12 sps:$4 sm:$0xff]  }
 0x1f5   : > { %4377 = vmatprep.subr.bf16.mxu1 %v5859_v30  ;;  %v5914_v30 = vld [vmem:[%s7761_s3 + $0x708] ss:$12 sps:$4 sm:$0xff]  }
 0x1f7   : > { %4337 = vmatpush1.bf16.msra.mxu0 %v5854_v33  ;;  %v5925_v33 = vld [vmem:[%s7761_s3 + $0x874] ss:$12 sps:$4 sm:$0xff]  }
 0x1f8   : > { %4378 = vmatpush1.bf16.msra.mxu1 %v5857_v34  ;;  %4338 = vmatprep.subr.bf16.mxu0 %v5862_v55  ;;  %v5920_v34 = vld [vmem:[%s7761_s3 + $0x6f0] ss:$12 sps:$4 sm:$0xff]  }
 0x1f9   : > { %4379 = vmatprep.subr.bf16.mxu1 %v5865_v39  ;;  %v5923_v55 = vld [vmem:[%s7761_s3 + $0x870] ss:$12 sps:$4 sm:$0xff]   ;;  %v1498_v39 = vrot.slane %v6907_v24, %v6603_v5 }
 0x1fb   : > { %4339 = vmatpush1.bf16.msra.mxu0 %v5860_v42  ;;  %v1506_v42 = vrot.slane %v6907_v24, %v6606_v6 }
 0x1fc   : > { %4380 = vmatpush1.bf16.msra.mxu1 %v5863_v44  ;;  %4340 = vmatprep.subr.bf16.mxu0 %v5868_v45  ;;  %v1453_v44 = vld [vmem:[#allocation2 + $0x10] sm:$0xff]  ;;  %v5931_v45 = vld [vmem:[%s7761_s3 + $0x85c] ss:$12 sps:$4 sm:$0xff]  }
 0x1fd   : > { %4381 = vmatprep.subr.bf16.mxu1 %v5871_v46  ;;  %v5926_v46 = vld [vmem:[%s7761_s3 + $0x6d8] ss:$12 sps:$4 sm:$0xff]  }
 0x1ff   : > { %4341 = vmatpush1.bf16.msra.mxu0 %v5866_v47  ;;  %v5929_v47 = vld [vmem:[%s7761_s3 + $0x858] ss:$12 sps:$4 sm:$0xff]  }
 0x200   : > { %4382 = vmatpush1.bf16.msra.mxu1 %v5869_v48  ;;  %4342 = vmatprep.subr.bf16.mxu0 %v5874_v50  ;;  %v1456_v48 = vld [vmem:[#allocation2 + $0x70] sm:$0xff]  ;;  %v1518_v50 = vrot.slane %v6907_v24, %v1485_v53  ;;  %v5932_v53 = vld [vmem:[%s7761_s3 + $0x6c0] ss:$12 sps:$4 sm:$0xff]  }
 0x201   : > { %4383 = vmatprep.subr.bf16.mxu1 %v5877_v51  ;;  %v1526_v51 = vrot.slane %v6907_v24, %v1493_v58  ;;  %v5935_v58 = vld [vmem:[%s7761_s3 + $0x840] ss:$12 sps:$4 sm:$0xff]  }
 0x203   : > { %4343 = vmatpush1.bf16.msra.mxu0 %v5872_v52  ;;  %v1551_v52 = vadd.f32 %v1498_v39, %v1451_v38  ;;  %v5970_v38 = vld [vmem:[%s7761_s3 + $0x934] ss:$12 sps:$4 sm:$0xff]  }
 0x204   : > { %4384 = vmatpush1.bf16.msra.mxu1 %v5875_v56  ;;  %4344 = vmatprep.subr.bf16.mxu0 %v5880_v57  ;;  %v1553_v56 = vadd.f32 %v1506_v42, %v1453_v44  ;;  %v1458_v57 = vld [vmem:[#allocation2 + $0x28] sm:$0xff]  ;;  %v5973_v39 = vld [vmem:[%s7761_s3 + $0xab4] ss:$12 sps:$4 sm:$0xff]   ;;  %v5968_v42 = vld [vmem:[%s7761_s3 + $0x930] ss:$12 sps:$4 sm:$0xff]  }
 0x205   : > { %4385 = vmatprep.subr.bf16.mxu1 %v5883_v60  ;;  %v5934_v60 = vld [vmem:[%s7761_s3 + $0x6c4] ss:$12 sps:$4 sm:$0xff]  }
 0x206   : > { %v5971_v44 = vld [vmem:[%s7761_s3 + $0xab0] ss:$12 sps:$4 sm:$0xff]  }
 0x207   : > { %4345 = vmatpush1.bf16.msra.mxu0 %v5878_v61  ;;  %v5937_v61 = vld [vmem:[%s7761_s3 + $0x844] ss:$12 sps:$4 sm:$0xff]  }
 0x208   : > { %4386 = vmatpush1.bf16.msra.mxu1 %v5881_v62  ;;  %4346 = vmatprep.subr.bf16.mxu0 %v5886_v63  ;;  %v1556_v62 = vadd.f32 %v1518_v50, %v1456_v48  ;;  %v1558_v63 = vadd.f32 %v1526_v51, %v1458_v57  ;;  %v5977_v48 = vld [vmem:[%s7761_s3 + $0xa98] ss:$12 sps:$4 sm:$0xff]  }
 0x209   : > { %4387 = vmatprep.subr.bf16.mxu1 %v5889_v59  ;;  %v1567_v59 = vmax.f32 %v1551_v52, 0.0  ;;  %v5982_v50 = vld [vmem:[%s7761_s3 + $0x904] ss:$12 sps:$4 sm:$0xff]   ;;  %v5980_v52 = vld [vmem:[%s7761_s3 + $0x900] ss:$12 sps:$4 sm:$0xff]  }
 0x20a   : > { %v5985_v51 = vld [vmem:[%s7761_s3 + $0xa84] ss:$12 sps:$4 sm:$0xff]   ;;  %v5988_v57 = vld [vmem:[%s7761_s3 + $0xa6c] ss:$12 sps:$4 sm:$0xff]  }
 0x20b   : > { %4347 = vmatpush1.bf16.msra.mxu0 %v5884_v0  ;;  %v1569_v0 = vmax.f32 %v1553_v56, 0.0  ;;  %v5983_v56 = vld [vmem:[%s7761_s3 + $0xa80] ss:$12 sps:$4 sm:$0xff]  }
 0x20c   : > { %4388 = vmatpush1.bf16.msra.mxu1 %v5887_v1  ;;  %4348 = vmatprep.subr.bf16.mxu0 %v5892_v2  ;;  %v5940_v1 = vld [vmem:[%s7761_s3 + $0x9ac] ss:$12 sps:$4 sm:$0xff]  }
 0x20d   : > { %4389 = vmatprep.subr.bf16.mxu1 %v5895_v3  ;;  %v5943_v2 = vld [vmem:[%s7761_s3 + $0xb2c] ss:$12 sps:$4 sm:$0xff]   ;;  %v5938_v3 = vld [vmem:[%s7761_s3 + $0x9a8] ss:$12 sps:$4 sm:$0xff]  }
 0x20f   : > { %4349 = vmatpush2.bf16.msra.mxu0 %v5890_v4  ;;  %v1572_v4 = vmax.f32 %v1556_v62, 0.0  ;;  %v5997_v62 = vld [vmem:[%s7761_s3 + $0xbd4] ss:$12 sps:$4 sm:$0xff]  }
 0x210   : > { %4390 = vmatpush2.bf16.msra.mxu1 %v5893_v7  ;;  %4350 = vmatprep.subr.bf16.mxu0 %v5898_v8  ;;  %v1574_v7 = vmax.f32 %v1558_v63, 0.0  ;;  %v7110_v8 = vpack.c.bf16 %v1567_v59, %v1567_v59  ;;  %v5992_v63 = vld [vmem:[%s7761_s3 + $0xa50] ss:$12 sps:$4 sm:$0xff]  }
 0x211   : > { %4391 = vmatprep.subr.bf16.mxu1 %v5901_v10  ;;  %v7112_v10 = vpack.c.bf16 %v1569_v0, %v1569_v0  ;;  %v5995_v59 = vld [vmem:[%s7761_s3 + $0xbd0] ss:$12 sps:$4 sm:$0xff]  }
 0x212   : > { %v6000_v0 = vld [vmem:[%s7761_s3 + $0xa3c] ss:$12 sps:$4 sm:$0xff]  }
 0x213   : > { %4351 = vmatpush2.bf16.msra.mxu0 %v5896_v11  ;;  %v5941_v11 = vld [vmem:[%s7761_s3 + $0xb28] ss:$12 sps:$4 sm:$0xff]  }
 0x214   : > { %4392 = vmatpush2.bf16.msra.mxu1 %v5899_v17  ;;  %4352 = vmatprep.subr.bf16.mxu0 %v5904_v18  ;;  %v5946_v17 = vld [vmem:[%s7761_s3 + $0x994] ss:$12 sps:$4 sm:$0xff]  }
 0x215   : > { %4393 = vmatprep.subr.bf16.mxu1 %v5907_v19  ;;  %v5949_v18 = vld [vmem:[%s7761_s3 + $0xb14] ss:$12 sps:$4 sm:$0xff]   ;;  %v5944_v19 = vld [vmem:[%s7761_s3 + $0x990] ss:$12 sps:$4 sm:$0xff]  }
 0x217   : > { %4353 = vmatpush2.bf16.msra.mxu0 %v5902_v20  ;;  %v7126_v20 = vpack.c.bf16 %v1572_v4, %v1572_v4  ;;  %v6006_v4 = vld [vmem:[%s7761_s3 + $0xa24] ss:$12 sps:$4 sm:$0xff]  }
 0x218   : > { %4394 = vmatpush2.bf16.msra.mxu1 %v5905_v21  ;;  %4354 = vmatprep.subr.bf16.mxu0 %v5910_v13  ;;  %v7128_v21 = vpack.c.bf16 %v1574_v7, %v1574_v7  ;;  %v5947_v13 = vld [vmem:[%s7761_s3 + $0xb10] ss:$12 sps:$4 sm:$0xff]  }
 0x219   : > { %4395 = vmatprep.subr.bf16.mxu1 %v5913_v25  ;;  %v5952_v25 = vld [vmem:[%s7761_s3 + $0x97c] ss:$12 sps:$4 sm:$0xff]   ;;  %v6009_v7 = vld [vmem:[%s7761_s3 + $0xba4] ss:$12 sps:$4 sm:$0xff]  }
 0x21b   : > { %4355 = vmatpush2.bf16.msra.mxu0 %v5908_v26  ;;  %v5955_v26 = vld [vmem:[%s7761_s3 + $0xafc] ss:$12 sps:$4 sm:$0xff]  }
 0x21c   : > { %4396 = vmatpush2.bf16.msra.mxu1 %v5911_v27  ;;  %4356 = vmatprep.subr.bf16.mxu0 %v5916_v28  ;;  %v5950_v27 = vld [vmem:[%s7761_s3 + $0x978] ss:$12 sps:$4 sm:$0xff]  }
 0x21d   : > { %4397 = vmatprep.subr.bf16.mxu1 %v5919_v29  ;;  %v5953_v28 = vld [vmem:[%s7761_s3 + $0xaf8] ss:$12 sps:$4 sm:$0xff]  }
 0x21e   : > { %v5958_v29 = vld [vmem:[%s7761_s3 + $0x964] ss:$12 sps:$4 sm:$0xff]  }
 0x21f   : > { %4357 = vmatpush2.bf16.msra.mxu0 %v5914_v30  ;;  %v5961_v30 = vld [vmem:[%s7761_s3 + $0xae4] ss:$12 sps:$4 sm:$0xff]  }
 0x220   : > { %4398 = vmatpush2.bf16.msra.mxu1 %v5917_v31  ;;  %4358 = vmatprep.subr.bf16.mxu0 %v5922_v32  ;;  %v5956_v31 = vld [vmem:[%s7761_s3 + $0x960] ss:$12 sps:$4 sm:$0xff]  }
 0x221   : > { %4399 = vmatprep.subr.bf16.mxu1 %v5925_v33  ;;  %v5959_v32 = vld [vmem:[%s7761_s3 + $0xae0] ss:$12 sps:$4 sm:$0xff]  }
 0x222   : > { %v5964_v33 = vld [vmem:[%s7761_s3 + $0x94c] ss:$12 sps:$4 sm:$0xff]  }
 0x223   : > { %4359 = vmatpush2.bf16.msra.mxu0 %v5920_v34  ;;  %v5967_v34 = vld [vmem:[%s7761_s3 + $0xacc] ss:$12 sps:$4 sm:$0xff]  }
 0x224   : > { %4400 = vmatpush2.bf16.msra.mxu1 %v5923_v55  ;;  %4360 = vmatprep.subr.bf16.mxu0 %v5928_v37  ;;  %v5962_v55 = vld [vmem:[%s7761_s3 + $0x948] ss:$12 sps:$4 sm:$0xff]  }
 0x225   : > { %4401 = vmatprep.subr.bf16.mxu1 %v5931_v45  ;;  %v5965_v37 = vld [vmem:[%s7761_s3 + $0xac8] ss:$12 sps:$4 sm:$0xff]  }
 0x226   : > { %v5976_v45 = vld [vmem:[%s7761_s3 + $0x91c] ss:$12 sps:$4 sm:$0xff]  }
 0x227   : > { %4361 = vmatpush2.bf16.msra.mxu0 %v5926_v46  ;;  %v5979_v46 = vld [vmem:[%s7761_s3 + $0xa9c] ss:$12 sps:$4 sm:$0xff]  }
 0x228   : > { %4402 = vmatpush2.bf16.msra.mxu1 %v5929_v47  ;;  %4362 = vmatprep.subr.bf16.mxu0 %v5934_v60  ;;  %v5974_v47 = vld [vmem:[%s7761_s3 + $0x918] ss:$12 sps:$4 sm:$0xff]  }
 0x229   : > { %4403 = vmatprep.subr.bf16.mxu1 %v5937_v61  ;;  %v5991_v60 = vld [vmem:[%s7761_s3 + $0xbec] ss:$12 sps:$4 sm:$0xff]   ;;  %v5986_v61 = vld [vmem:[%s7761_s3 + $0xa68] ss:$12 sps:$4 sm:$0xff]  }
 0x22b   : > { %4363 = vmatpush2.bf16.msra.mxu0 %v5932_v53  ;;  %v5989_v53 = vld [vmem:[%s7761_s3 + $0xbe8] ss:$12 sps:$4 sm:$0xff]  }
 0x22c   : > { %4404 = vmatpush2.bf16.msra.mxu1 %v5935_v58  ;;  %4414 = vmatprep.subr.bf16.mxu0 %v5940_v1  ;;  %v5994_v58 = vld [vmem:[%s7761_s3 + $0xa54] ss:$12 sps:$4 sm:$0xff]   ;;  %v6003_v1 = vld [vmem:[%s7761_s3 + $0xbbc] ss:$12 sps:$4 sm:$0xff]  }
 0x22d   : > { %4455 = vmatprep.subr.bf16.mxu1 %v5943_v2  ;;  %v5998_v2 = vld [vmem:[%s7761_s3 + $0xa38] ss:$12 sps:$4 sm:$0xff]  }
 0x22e   : > { %4365 = vmatmul.mubr.bf16.vlgmr.msra.gmra.mxu0 %v7110_v8 }
 0x22f   : > { %4406 = vmatmul.mubr.bf16.vlgmr.msra.gmra.mxu1 %v7112_v10  ;;  %4415 = vmatpush1.bf16.msra.mxu0 %v5938_v3  ;;  %v6001_v3 = vld [vmem:[%s7761_s3 + $0xbb8] ss:$12 sps:$4 sm:$0xff]  }
 0x230   : > { %4456 = vmatpush1.bf16.msra.mxu1 %v5941_v11  ;;  %4416 = vmatprep.subr.bf16.mxu0 %v5946_v17  ;;  %v6004_v11 = vld [vmem:[%s7761_s3 + $0xa20] ss:$12 sps:$4 sm:$0xff]  }
 0x231   : > { %4457 = vmatprep.subr.bf16.mxu1 %v5949_v18  ;;  %4446 = vmatprep.mubr.bf16.mxu0 %v7126_v20  ;;  %v6007_v17 = vld [vmem:[%s7761_s3 + $0xba0] ss:$12 sps:$4 sm:$0xff]  }
 0x232   : > { %4487 = vmatprep.mubr.bf16.mxu1 %v7128_v21  ;;  %v6012_v18 = vld [vmem:[%s7761_s3 + $0xa0c] ss:$12 sps:$4 sm:$0xff]  }
 0x233   : > { %4417 = vmatpush1.bf16.msra.mxu0 %v5944_v19  ;;  %v6015_v19 = vld [vmem:[%s7761_s3 + $0xb8c] ss:$12 sps:$4 sm:$0xff]  }
 0x234   : > { %4458 = vmatpush1.bf16.msra.mxu1 %v5947_v13  ;;  %4418 = vmatprep.subr.bf16.mxu0 %v5952_v25  ;;  %v6010_v13 = vld [vmem:[%s7761_s3 + $0xa08] ss:$12 sps:$4 sm:$0xff]  }
 0x235   : > { %4459 = vmatprep.subr.bf16.mxu1 %v5955_v26  ;;  %v6013_v25 = vld [vmem:[%s7761_s3 + $0xb88] ss:$12 sps:$4 sm:$0xff]  }
 0x236   : > { %v6018_v26 = vld [vmem:[%s7761_s3 + $0x9f4] ss:$12 sps:$4 sm:$0xff]  }
 0x237   : > { %4419 = vmatpush1.bf16.msra.mxu0 %v5950_v27  ;;  %v6021_v27 = vld [vmem:[%s7761_s3 + $0xb74] ss:$12 sps:$4 sm:$0xff]  }
 0x238   : > { %4460 = vmatpush1.bf16.msra.mxu1 %v5953_v28  ;;  %4420 = vmatprep.subr.bf16.mxu0 %v5958_v29  ;;  %v6016_v28 = vld [vmem:[%s7761_s3 + $0x9f0] ss:$12 sps:$4 sm:$0xff]  }
 0x239   : > { %4461 = vmatprep.subr.bf16.mxu1 %v5961_v30  ;;  %v6019_v29 = vld [vmem:[%s7761_s3 + $0xb70] ss:$12 sps:$4 sm:$0xff]  }
 0x23a   : > { %v6024_v30 = vld [vmem:[%s7761_s3 + $0x9dc] ss:$12 sps:$4 sm:$0xff]  }
 0x23b   : > { %4421 = vmatpush1.bf16.msra.mxu0 %v5956_v31  ;;  %v1455_v31 = vld [vmem:[#allocation2 + $0x60] sm:$0xff] }
 0x23c   : > { %4462 = vmatpush1.bf16.msra.mxu1 %v5959_v32  ;;  %4422 = vmatprep.subr.bf16.mxu0 %v5964_v33  ;;  %v1514_v32 = vrot.slane %v6907_v24, %v1481_v9  ;;  %v1522_v33 = vrot.slane %v6907_v24, %v1489_v43  ;;  %v6025_v9 = vld [vmem:[%s7761_s3 + $0xb58] ss:$12 sps:$4 sm:$0xff]  }
 0x23d   : > { %4463 = vmatprep.subr.bf16.mxu1 %v5967_v34  ;;  %v1457_v34 = vld [vmem:[#allocation2 + $0x78] sm:$0xff]  ;;  %v6030_v43 = vld [vmem:[%s7761_s3 + $0x9c4] ss:$12 sps:$4 sm:$0xff]  }
 0x23e   : > { %v1555_v49 = vadd.f32 %v1514_v32, %v1455_v31  ;;  %v6033_v24 = vld [vmem:[%s7761_s3 + $0xb44] ss:$12 sps:$4 sm:$0xff]  }
 0x23f   : > { %4423 = vmatpush1.bf16.msra.mxu0 %v5962_v55  ;;  %v6027_v55 = vld [vmem:[%s7761_s3 + $0xb5c] ss:$12 sps:$4 sm:$0xff]   ;;  %v6054_v32 = vld [vmem:[%s7761_s3 + $0xf8] ss:$12 sps:$4 sm:$0xff]  }
 0x240   : > { %4464 = vmatpush1.bf16.msra.mxu1 %v5965_v37  ;;  %4424 = vmatprep.subr.bf16.mxu0 %v5970_v38  ;;  %v6022_v37 = vld [vmem:[%s7761_s3 + $0x9d8] ss:$12 sps:$4 sm:$0xff]   ;;  %v1557_v38 = vadd.f32 %v1522_v33, %v1457_v34  ;;  %v6053_v31 = vld [vmem:[%s7761_s3 + $0x1d0] ss:$12 sps:$4 sm:$0xff]  }
 0x241   : > { %4465 = vmatprep.subr.bf16.mxu1 %v5973_v39  ;;  %v6028_v39 = vld [vmem:[%s7761_s3 + $0x9c0] ss:$12 sps:$4 sm:$0xff]   ;;  %v6055_v33 = vld [vmem:[%s7761_s3 + $0x278] ss:$12 sps:$4 sm:$0xff]  }
 0x242   : > { %v6056_v34 = vld [vmem:[%s7761_s3 + $0x38] ss:$12 sps:$4 sm:$0xff]  }
 0x243   : > { %4425 = vmatpush1.bf16.msra.mxu0 %v5968_v42  ;;  %v6031_v42 = vld [vmem:[%s7761_s3 + $0xb40] ss:$12 sps:$4 sm:$0xff]  }
 0x244   : > { %4466 = vmatpush1.bf16.msra.mxu1 %v5971_v44  ;;  %4426 = vmatprep.subr.bf16.mxu0 %v5976_v45  ;;  %v7314_v44 = vld [vmem:[%s7762_s4] sm:$0x7]  ;;  %v1571_v45 = vmax.f32 %v1555_v49, 0.0 }
 0x245   : > { %4467 = vmatprep.subr.bf16.mxu1 %v5979_v46  ;;  %v1573_v46 = vmax.f32 %v1557_v38, 0.0  ;;  %v6060_v49 = vld [vmem:[%s7761_s3 + $0x20] ss:$12 sps:$4 sm:$0xff]  }
 0x246   : > { %v6061_v38 = vld [vmem:[%s7761_s3 + $0x1a0] ss:$12 sps:$4 sm:$0xff]  }
 0x247   : > { %4427 = vmatpush1.bf16.msra.mxu0 %v5974_v47  ;;  %v6034_v47 = vld [vmem:[%s7761_s3 + $0x170] ss:$12 sps:$4 sm:$0xff]  }
 0x248   : > { %4468 = vmatpush1.bf16.msra.mxu1 %v5977_v48  ;;  %4428 = vmatprep.subr.bf16.mxu0 %v5982_v50  ;;  %v6035_v48 = vld [vmem:[%s7761_s3 + $0x2f0] ss:$12 sps:$4 sm:$0xff]  }
 0x249   : > { %4469 = vmatprep.subr.bf16.mxu1 %v5985_v51  ;;  %v6036_v50 = vld [vmem:[%s7761_s3 + $0xb0] ss:$12 sps:$4 sm:$0xff]   ;;  %v7325_v51 = vpack.c.bf16 %v1571_v45, %v1571_v45 }
 0x24a   : > { %v6066_v45 = vld [vmem:[%s7761_s3 + $0x470] ss:$12 sps:$4 sm:$0xff]  }
 0x24b   : > { %4429 = vmatpush1.bf16.msra.mxu0 %v5980_v52  ;;  %v7327_v52 = vpack.c.bf16 %v1573_v46, %v1573_v46  ;;  %v6067_v46 = vld [vmem:[%s7761_s3 + $0x5f0] ss:$12 sps:$4 sm:$0xff]  }
 0x24c   : > { %4470 = vmatpush1.bf16.msra.mxu1 %v5983_v56  ;;  %4430 = vmatprep.subr.bf16.mxu0 %v5988_v57  ;;  %v6037_v56 = vld [vmem:[%s7761_s3 + $0x230] ss:$12 sps:$4 sm:$0xff]   ;;  %v2108_v57 = vrot.slane %v7314_v44, %v6603_v5  ;;  %v6041_v5 = vld [vmem:[%s7761_s3 + $0x218] ss:$12 sps:$4 sm:$0xff]  }
 0x24d   : > { %4471 = vmatprep.subr.bf16.mxu1 %v5991_v60  ;;  %v6038_v60 = vld [vmem:[%s7761_s3 + $0x158] ss:$12 sps:$4 sm:$0xff]  }
 0x24f   : > { %4431 = vmatpush2.bf16.msra.mxu0 %v5986_v61  ;;  %v6039_v61 = vld [vmem:[%s7761_s3 + $0x2d8] ss:$12 sps:$4 sm:$0xff]  }
 0x250   : > { %4472 = vmatpush2.bf16.msra.mxu1 %v5989_v53  ;;  %4432 = vmatprep.subr.bf16.mxu0 %v5994_v58  ;;  %v2112_v53 = vrot.slane %v7314_v44, %v6571_v54  ;;  %v6040_v58 = vld [vmem:[%s7761_s3 + $0x98] ss:$12 sps:$4 sm:$0xff]   ;;  %v6042_v54 = vld [vmem:[%s7761_s3 + $0x140] ss:$12 sps:$4 sm:$0xff]  }
 0x251   : > { %4473 = vmatprep.subr.bf16.mxu1 %v5997_v62 }
 0x253   : > { %4433 = vmatpush2.bf16.msra.mxu0 %v5992_v63 }
 0x254   : > { %4474 = vmatpush2.bf16.msra.mxu1 %v5995_v59  ;;  %4434 = vmatprep.subr.bf16.mxu0 %v6000_v0 }
 0x255   : > { %4475 = vmatprep.subr.bf16.mxu1 %v6003_v1 }
 0x257   : > { %4435 = vmatpush2.bf16.msra.mxu0 %v5998_v2  ;;  %v6043_v2 = vld [vmem:[%s7761_s3 + $0x2c0] ss:$12 sps:$4 sm:$0xff]  }
 0x258   : > { %4476 = vmatpush2.bf16.msra.mxu1 %v6001_v3  ;;  %4436 = vmatprep.subr.bf16.mxu0 %v6006_v4 }
 0x259   : > { %4477 = vmatprep.subr.bf16.mxu1 %v6009_v7  ;;  %v6044_v7 = vld [vmem:[%s7761_s3 + $0x80] ss:$12 sps:$4 sm:$0xff]  }
 0x25b   : > { %4437 = vmatpush2.bf16.msra.mxu0 %v6004_v11 }
 0x25c   : > { %4478 = vmatpush2.bf16.msra.mxu1 %v6007_v17  ;;  %4438 = vmatprep.subr.bf16.mxu0 %v6012_v18  ;;  %v6045_v18 = vld [vmem:[%s7761_s3 + $0x200] ss:$12 sps:$4 sm:$0xff]  }
 0x25d   : > { %4479 = vmatprep.subr.bf16.mxu1 %v6015_v19 }
 0x25f   : > { %4439 = vmatpush2.bf16.msra.mxu0 %v6010_v13  ;;  %v6046_v13 = vld [vmem:[%s7761_s3 + $0x128] ss:$12 sps:$4 sm:$0xff]  }
 0x260   : > { %4480 = vmatpush2.bf16.msra.mxu1 %v6013_v25  ;;  %4440 = vmatprep.subr.bf16.mxu0 %v6018_v26 }
 0x261   : > { %4481 = vmatprep.subr.bf16.mxu1 %v6021_v27  ;;  %v6049_v27 = vld [vmem:[%s7761_s3 + $0x1e8] ss:$12 sps:$4 sm:$0xff]  }
 0x263   : > { %4441 = vmatpush2.bf16.msra.mxu0 %v6016_v28  ;;  %v6050_v28 = vld [vmem:[%s7761_s3 + $0x110] ss:$12 sps:$4 sm:$0xff]  }
 0x264   : > { %4482 = vmatpush2.bf16.msra.mxu1 %v6019_v29  ;;  %4442 = vmatprep.subr.bf16.mxu0 %v6024_v30  ;;  %v6051_v29 = vld [vmem:[%s7761_s3 + $0x290] ss:$12 sps:$4 sm:$0xff]  }
 0x265   : > { %4483 = vmatprep.subr.bf16.mxu1 %v6027_v55  ;;  %v6052_v30 = vld [vmem:[%s7761_s3 + $0x50] ss:$12 sps:$4 sm:$0xff]   ;;  %v6057_v55 = vld [vmem:[%s7761_s3 + $0x1b8] ss:$12 sps:$4 sm:$0xff]  }
 0x267   : > { %4443 = vmatpush2.bf16.msra.mxu0 %v6022_v37  ;;  %v6058_v37 = vld [vmem:[%s7761_s3 + $0xe0] ss:$12 sps:$4 sm:$0xff]  }
 0x268   : > { %4484 = vmatpush2.bf16.msra.mxu1 %v6025_v9  ;;  %4444 = vmatprep.subr.bf16.mxu0 %v6030_v43  ;;  %v6059_v9 = vld [vmem:[%s7761_s3 + $0x260] ss:$12 sps:$4 sm:$0xff]   ;;  %v6062_v43 = vld [vmem:[%s7761_s3 + $0xc8] ss:$12 sps:$4 sm:$0xff]  }
 0x269   : > { %4485 = vmatprep.subr.bf16.mxu1 %v6033_v24  ;;  %v6063_v24 = vld [vmem:[%s7761_s3 + $0x248] ss:$12 sps:$4 sm:$0xff]  }
 0x26b   : > { %4445 = vmatpush2.bf16.msra.mxu0 %v6028_v39  ;;  %v6064_v39 = vld [vmem:[%s7761_s3 + $0x8] ss:$12 sps:$4 sm:$0xff]  }
 0x26c   : > { %4486 = vmatpush2.bf16.msra.mxu1 %v6031_v42  ;;  %5431 = vmatprep.subr.bf16.mxu0 %v6034_v47  ;;  %v6065_v42 = vld [vmem:[%s7761_s3 + $0x188] ss:$12 sps:$4 sm:$0xff]   ;;  %v6068_v47 = vld [vmem:[%s7761_s3 + $0x3b0] ss:$12 sps:$4 sm:$0xff]  }
 0x26d   : > { %5453 = vmatprep.subr.bf16.mxu1 %v6035_v48  ;;  %v6069_v48 = vld [vmem:[%s7761_s3 + $0x530] ss:$12 sps:$4 sm:$0xff]  }
 0x26e   : > { %v4202_v62 = vpop.f32.mrf.mxu0  ;;  %4447 = vmatmul.mubr.bf16.vlgmr.msra.gmra.mxu0 %v7325_v51 }
 0x26f   : > { %v4243_v63 = vpop.f32.mrf.mxu1  ;;  %4488 = vmatmul.mubr.bf16.vlgmr.msra.gmra.mxu1 %v7327_v52  ;;  %v4203_v59 = vadd.f32 %v4202_v62, %v2108_v57  ;;  %5432 = vmatpush3.bf16.msra.mxu0 %v6036_v50  ;;  %v6070_v50 = vld [vmem:[%s7761_s3 + $0x458] ss:$12 sps:$4 sm:$0xff]   ;;  %v6079_v62 = vld [vmem:[%s7761_s3 + $0x5a8] ss:$12 sps:$4 sm:$0xff]  }
 0x270   : > { %5454 = vmatpush3.bf16.msra.mxu1 %v6037_v56  ;;  %v4204_v0 = vpop.f32.mrf.mxu0  ;;  %5433 = vmatprep.subr.bf16.mxu0 %v6038_v60  ;;  %v6071_v56 = vld [vmem:[%s7761_s3 + $0x5d8] ss:$12 sps:$4 sm:$0xff]  }
 0x271   : > { %v4245_v1 = vpop.f32.mrf.mxu1  ;;  %5455 = vmatprep.subr.bf16.mxu1 %v6039_v61  ;;  %v7356_v3 = vadd.f32 %v4243_v63, %v4203_v59  ;;  %v4205_v4 = vadd.f32 %v4204_v0, %v2112_v53  ;;  %4528 = vmatprep.mubr.bf16.mxu0 %v6620_v15  ;;  %v6047_v15 = vld [vmem:[%s7761_s3 + $0x2a8] ss:$12 sps:$4 sm:$0xff]   ;;  %v6072_v57 = vld [vmem:[%s7761_s3 + $0x398] ss:$12 sps:$4 sm:$0xff]   ;;  %v6074_v61 = vld [vmem:[%s7761_s3 + $0x440] ss:$12 sps:$4 sm:$0xff]  }
 0x272   : > { %4568 = vmatprep.mubr.bf16.mxu1 %v6622_v16  ;;  %v4206_v11 = vpop.f32.mrf.mxu0  ;;  %v6048_v16 = vld [vmem:[%s7761_s3 + $0x68] ss:$12 sps:$4 sm:$0xff]   ;;  %v6073_v60 = vld [vmem:[%s7761_s3 + $0x518] ss:$12 sps:$4 sm:$0xff]   ;;  %v6075_v53 = vld [vmem:[%s7761_s3 + $0x5c0] ss:$12 sps:$4 sm:$0xff]  }
 0x273   : > { %v4247_v17 = vpop.f32.mrf.mxu1  ;;  %v7366_v19 = vadd.f32 %v4245_v1, %v4205_v4  ;;  %5434 = vmatpush3.bf16.msra.mxu0 %v6040_v58  ;;  %v6078_v58 = vld [vmem:[%s7761_s3 + $0x428] ss:$12 sps:$4 sm:$0xff]   ;;  %v6082_v63 = vld [vmem:[%s7761_s3 + $0x410] ss:$12 sps:$4 sm:$0xff]   ;;  %v6086_v0 = vld [vmem:[%s7761_s3 + $0x3f8] ss:$12 sps:$4 sm:$0xff]  }
 0x274   : > { %5456 = vmatpush3.bf16.msra.mxu1 %v6041_v5  ;;  %v4207_v25 = vpop.f32.mrf.mxu0  ;;  %5435 = vmatprep.subr.bf16.mxu0 %v6042_v54  ;;  %v6083_v5 = vld [vmem:[%s7761_s3 + $0x590] ss:$12 sps:$4 sm:$0xff]   ;;  %v6087_v1 = vld [vmem:[%s7761_s3 + $0x578] ss:$12 sps:$4 sm:$0xff]   ;;  %v6091_v11 = vld [vmem:[%s7761_s3 + $0x560] ss:$12 sps:$4 sm:$0xff]  }
 0x275   : > { %v4248_v26 = vpop.f32.mrf.mxu1  ;;  %5457 = vmatprep.subr.bf16.mxu1 %v6043_v2  ;;  %v6084_v59 = vld [vmem:[%s7761_s3 + $0x350] ss:$12 sps:$4 sm:$0xff]   ;;  %v6088_v2 = vld [vmem:[%s7761_s3 + $0x338] ss:$12 sps:$4 sm:$0xff]   ;;  %v6092_v17 = vld [vmem:[%s7761_s3 + $0x320] ss:$12 sps:$4 sm:$0xff]  }
 0x276   : > { %v6085_v54 = vld [vmem:[%s7761_s3 + $0x4d0] ss:$12 sps:$4 sm:$0xff]   ;;  %v6089_v4 = vld [vmem:[%s7761_s3 + $0x4b8] ss:$12 sps:$4 sm:$0xff]   ;;  %v6095_v25 = vld [vmem:[%s7761_s3 + $0x548] ss:$12 sps:$4 sm:$0xff]  }
 0x277   : > { %5436 = vmatpush3.bf16.msra.mxu0 %v6044_v7  ;;  %v6090_v7 = vld [vmem:[%s7761_s3 + $0x3e0] ss:$12 sps:$4 sm:$0xff]   ;;  %v6096_v26 = vld [vmem:[%s7761_s3 + $0x308] ss:$12 sps:$4 sm:$0xff]  }
 0x278   : > { %5458 = vmatpush3.bf16.msra.mxu1 %v6045_v18  ;;  %5437 = vmatprep.subr.bf16.mxu0 %v6046_v13  ;;  %v6093_v18 = vld [vmem:[%s7761_s3 + $0x4a0] ss:$12 sps:$4 sm:$0xff]   ;;  %v6094_v13 = vld [vmem:[%s7761_s3 + $0x3c8] ss:$12 sps:$4 sm:$0xff]  }
 0x279   : > { %5459 = vmatprep.subr.bf16.mxu1 %v6047_v15  ;;  %v6097_v15 = vld [vmem:[%s7761_s3 + $0x488] ss:$12 sps:$4 sm:$0xff]  }
 0x27b   : > { %5438 = vmatpush3.bf16.msra.mxu0 %v6048_v16  ;;  %v6098_v16 = vld [vmem:[%s7761_s3 + $0x770] ss:$12 sps:$4 sm:$0xff]  }
 0x27c   : > { %5460 = vmatpush3.bf16.msra.mxu1 %v6049_v27  ;;  %5439 = vmatprep.subr.bf16.mxu0 %v6050_v28  ;;  %v6099_v27 = vld [vmem:[%s7761_s3 + $0x8f0] ss:$12 sps:$4 sm:$0xff]  }
 0x27d   : > { %5461 = vmatprep.subr.bf16.mxu1 %v6051_v29  ;;  %v6100_v28 = vld [vmem:[%s7761_s3 + $0x6b0] ss:$12 sps:$4 sm:$0xff]  }
 0x27e   : > { %v6101_v29 = vld [vmem:[%s7761_s3 + $0x830] ss:$12 sps:$4 sm:$0xff]  }
 0x27f   : > { %5440 = vmatpush3.bf16.msra.mxu0 %v6052_v30  ;;  %v6102_v30 = vld [vmem:[%s7761_s3 + $0x758] ss:$12 sps:$4 sm:$0xff]  }
 0x280   : > { %5462 = vmatpush3.bf16.msra.mxu1 %v6053_v31  ;;  %5441 = vmatprep.subr.bf16.mxu0 %v6054_v32  ;;  %v6103_v31 = vld [vmem:[%s7761_s3 + $0x8d8] ss:$12 sps:$4 sm:$0xff]  }
 0x281   : > { %5463 = vmatprep.subr.bf16.mxu1 %v6055_v33 }
 0x283   : > { %5442 = vmatpush3.bf16.msra.mxu0 %v6056_v34 }
 0x284   : > { %5464 = vmatpush3.bf16.msra.mxu1 %v6057_v55  ;;  %5443 = vmatprep.subr.bf16.mxu0 %v6058_v37  ;;  %v6104_v55 = vld [vmem:[%s7761_s3 + $0x698] ss:$12 sps:$4 sm:$0xff]  }
 0x285   : > { %5465 = vmatprep.subr.bf16.mxu1 %v6059_v9  ;;  %v6105_v37 = vld [vmem:[%s7761_s3 + $0x818] ss:$12 sps:$4 sm:$0xff]  }
 0x287   : > { %5444 = vmatpush3.bf16.msra.mxu0 %v6060_v49 }
 0x288   : > { %5466 = vmatpush3.bf16.msra.mxu1 %v6061_v38  ;;  %5445 = vmatprep.subr.bf16.mxu0 %v6062_v43 }
 0x289   : > { %5467 = vmatprep.subr.bf16.mxu1 %v6063_v24 }
 0x28b   : > { %5446 = vmatpush3.bf16.msra.mxu0 %v6064_v39 }
 0x28c   : > { %5468 = vmatpush3.bf16.msra.mxu1 %v6065_v42  ;;  %5475 = vmatprep.subr.bf16.mxu0 %v6066_v45  ;;  %v6108_v42 = vld [vmem:[%s7761_s3 + $0x680] ss:$12 sps:$4 sm:$0xff]  }
 0x28d   : > { %5497 = vmatprep.subr.bf16.mxu1 %v6067_v46  ;;  %v6109_v45 = vld [vmem:[%s7761_s3 + $0x800] ss:$12 sps:$4 sm:$0xff]  }
 0x28e   : > { %4529 = vmatmul.mubr.bf16.vlgmr.msra.gmra.mxu0 %v6663_v35  ;;  %v6076_v35 = vld [vmem:[%s7761_s3 + $0x380] ss:$12 sps:$4 sm:$0xff]  }
 0x28f   : > { %4569 = vmatmul.mubr.bf16.vlgmr.msra.gmra.mxu1 %v6665_v36  ;;  %5476 = vmatpush3.bf16.msra.mxu0 %v6068_v47  ;;  %v6077_v36 = vld [vmem:[%s7761_s3 + $0x500] ss:$12 sps:$4 sm:$0xff]   ;;  %v6112_v47 = vld [vmem:[%s7761_s3 + $0x668] ss:$12 sps:$4 sm:$0xff]  }
 0x290   : > { %5498 = vmatpush3.bf16.msra.mxu1 %v6069_v48  ;;  %5477 = vmatprep.subr.bf16.mxu0 %v6070_v50  ;;  %v6113_v48 = vld [vmem:[%s7761_s3 + $0x7e8] ss:$12 sps:$4 sm:$0xff]   ;;  %v6114_v50 = vld [vmem:[%s7761_s3 + $0x710] ss:$12 sps:$4 sm:$0xff]  }
 0x291   : > { %5499 = vmatprep.subr.bf16.mxu1 %v6071_v56  ;;  %4608 = vmatprep.mubr.bf16.mxu0 %v6767_v22  ;;  %v6080_v22 = vld [vmem:[%s7761_s3 + $0x368] ss:$12 sps:$4 sm:$0xff]   ;;  %v6115_v56 = vld [vmem:[%s7761_s3 + $0x890] ss:$12 sps:$4 sm:$0xff]  }
 0x292   : > { %4648 = vmatprep.mubr.bf16.mxu1 %v6769_v23  ;;  %v6081_v23 = vld [vmem:[%s7761_s3 + $0x4e8] ss:$12 sps:$4 sm:$0xff]  }
 0x293   : > { %5478 = vmatpush3.bf16.msra.mxu0 %v6072_v57  ;;  %v6116_v57 = vld [vmem:[%s7761_s3 + $0x650] ss:$12 sps:$4 sm:$0xff]  }
 0x294   : > { %5500 = vmatpush3.bf16.msra.mxu1 %v6073_v60  ;;  %5479 = vmatprep.subr.bf16.mxu0 %v6074_v61  ;;  %v6117_v60 = vld [vmem:[%s7761_s3 + $0x7d0] ss:$12 sps:$4 sm:$0xff]   ;;  %v6118_v61 = vld [vmem:[%s7761_s3 + $0x6f8] ss:$12 sps:$4 sm:$0xff]  }
 0x295   : > { %5501 = vmatprep.subr.bf16.mxu1 %v6075_v53  ;;  %v6119_v53 = vld [vmem:[%s7761_s3 + $0x878] ss:$12 sps:$4 sm:$0xff]  }
 0x297   : > { %5480 = vmatpush3.bf16.msra.mxu0 %v6076_v35  ;;  %v6120_v35 = vld [vmem:[%s7761_s3 + $0x638] ss:$12 sps:$4 sm:$0xff]  }
 0x298   : > { %5502 = vmatpush3.bf16.msra.mxu1 %v6077_v36  ;;  %5481 = vmatprep.subr.bf16.mxu0 %v6078_v58  ;;  %v6121_v36 = vld [vmem:[%s7761_s3 + $0x7b8] ss:$12 sps:$4 sm:$0xff]   ;;  %v6122_v58 = vld [vmem:[%s7761_s3 + $0x6e0] ss:$12 sps:$4 sm:$0xff]  }
 0x299   : > { %5503 = vmatprep.subr.bf16.mxu1 %v6079_v62  ;;  %v6123_v62 = vld [vmem:[%s7761_s3 + $0x860] ss:$12 sps:$4 sm:$0xff]  }
 0x29b   : > { %5482 = vmatpush3.bf16.msra.mxu0 %v6080_v22  ;;  %v6124_v22 = vld [vmem:[%s7761_s3 + $0x620] ss:$12 sps:$4 sm:$0xff]  }
 0x29c   : > { %5504 = vmatpush3.bf16.msra.mxu1 %v6081_v23  ;;  %5483 = vmatprep.subr.bf16.mxu0 %v6082_v63  ;;  %v6125_v23 = vld [vmem:[%s7761_s3 + $0x7a0] ss:$12 sps:$4 sm:$0xff]   ;;  %v6126_v63 = vld [vmem:[%s7761_s3 + $0x6c8] ss:$12 sps:$4 sm:$0xff]  }
 0x29d   : > { %5505 = vmatprep.subr.bf16.mxu1 %v6083_v5  ;;  %v6127_v5 = vld [vmem:[%s7761_s3 + $0x848] ss:$12 sps:$4 sm:$0xff]  }
 0x29f   : > { %5484 = vmatpush3.bf16.msra.mxu0 %v6084_v59  ;;  %v6128_v59 = vld [vmem:[%s7761_s3 + $0x608] ss:$12 sps:$4 sm:$0xff]  }
 0x2a0   : > { %5506 = vmatpush3.bf16.msra.mxu1 %v6085_v54  ;;  %5485 = vmatprep.subr.bf16.mxu0 %v6086_v0  ;;  %v6129_v54 = vld [vmem:[%s7761_s3 + $0x788] ss:$12 sps:$4 sm:$0xff]   ;;  %v6130_v0 = vld [vmem:[%s7761_s3 + $0xa70] ss:$12 sps:$4 sm:$0xff]  }
 0x2a1   : > { %5507 = vmatprep.subr.bf16.mxu1 %v6087_v1  ;;  %v6131_v1 = vld [vmem:[%s7761_s3 + $0xbf0] ss:$12 sps:$4 sm:$0xff]  }
 0x2a3   : > { %5486 = vmatpush3.bf16.msra.mxu0 %v6088_v2  ;;  %v6132_v2 = vld [vmem:[%s7761_s3 + $0x9b0] ss:$12 sps:$4 sm:$0xff]  }
 0x2a4   : > { %5508 = vmatpush3.bf16.msra.mxu1 %v6089_v4  ;;  %5487 = vmatprep.subr.bf16.mxu0 %v6090_v7  ;;  %v6133_v4 = vld [vmem:[%s7761_s3 + $0xb30] ss:$12 sps:$4 sm:$0xff]   ;;  %v6134_v7 = vld [vmem:[%s7761_s3 + $0xa58] ss:$12 sps:$4 sm:$0xff]  }
 0x2a5   : > { %5509 = vmatprep.subr.bf16.mxu1 %v6091_v11  ;;  %v6135_v11 = vld [vmem:[%s7761_s3 + $0xbd8] ss:$12 sps:$4 sm:$0xff]  }
 0x2a7   : > { %5488 = vmatpush3.bf16.msra.mxu0 %v6092_v17  ;;  %v6136_v17 = vld [vmem:[%s7761_s3 + $0x998] ss:$12 sps:$4 sm:$0xff]  }
 0x2a8   : > { %5510 = vmatpush3.bf16.msra.mxu1 %v6093_v18  ;;  %5489 = vmatprep.subr.bf16.mxu0 %v6094_v13  ;;  %v6137_v18 = vld [vmem:[%s7761_s3 + $0xb18] ss:$12 sps:$4 sm:$0xff]   ;;  %v6138_v13 = vld [vmem:[%s7761_s3 + $0xa40] ss:$12 sps:$4 sm:$0xff]  }
 0x2a9   : > { %5511 = vmatprep.subr.bf16.mxu1 %v6095_v25  ;;  %v6141_v25 = vld [vmem:[%s7761_s3 + $0xb00] ss:$12 sps:$4 sm:$0xff]  }
 0x2ab   : > { %5490 = vmatpush3.bf16.msra.mxu0 %v6096_v26  ;;  %v6142_v26 = vld [vmem:[%s7761_s3 + $0xa28] ss:$12 sps:$4 sm:$0xff]  }
 0x2ac   : > { %5512 = vmatpush3.bf16.msra.mxu1 %v6097_v15  ;;  %5519 = vmatprep.subr.bf16.mxu0 %v6098_v16  ;;  %v6145_v15 = vld [vmem:[%s7761_s3 + $0xae8] ss:$12 sps:$4 sm:$0xff]   ;;  %v6146_v16 = vld [vmem:[%s7761_s3 + $0xa10] ss:$12 sps:$4 sm:$0xff]  }
 0x2ad   : > { %5541 = vmatprep.subr.bf16.mxu1 %v6099_v27  ;;  %v6147_v27 = vld [vmem:[%s7761_s3 + $0xb90] ss:$12 sps:$4 sm:$0xff]  }
 0x2ae   : > { %v4284_v32 = vpop.f32.mrf.mxu0  ;;  %4609 = vmatmul.mubr.bf16.vlgmr.msra.gmra.mxu0 %v6883_v12  ;;  %v6106_v12 = vld [vmem:[%s7761_s3 + $0x740] ss:$12 sps:$4 sm:$0xff]  }
 0x2af   : > { %v4325_v33 = vpop.f32.mrf.mxu1  ;;  %4649 = vmatmul.mubr.bf16.vlgmr.msra.gmra.mxu1 %v6885_v14  ;;  %v4285_v34 = vadd.f32 %v4284_v32, %v7356_v3  ;;  %5520 = vmatpush3.bf16.msra.mxu0 %v6100_v28  ;;  %v6107_v14 = vld [vmem:[%s7761_s3 + $0x8c0] ss:$12 sps:$4 sm:$0xff]   ;;  %v6148_v28 = vld [vmem:[%s7761_s3 + $0x950] ss:$12 sps:$4 sm:$0xff]   ;;  %v6152_v32 = vld [vmem:[%s7761_s3 + $0x938] ss:$12 sps:$4 sm:$0xff]  }
 0x2b0   : > { %5542 = vmatpush3.bf16.msra.mxu1 %v6101_v29  ;;  %v4286_v9 = vpop.f32.mrf.mxu0  ;;  %5521 = vmatprep.subr.bf16.mxu0 %v6102_v30  ;;  %v6149_v29 = vld [vmem:[%s7761_s3 + $0xad0] ss:$12 sps:$4 sm:$0xff]   ;;  %v6150_v30 = vld [vmem:[%s7761_s3 + $0x9f8] ss:$12 sps:$4 sm:$0xff]  }
 0x2b1   : > { %v4327_v49 = vpop.f32.mrf.mxu1  ;;  %5543 = vmatprep.subr.bf16.mxu1 %v6103_v31  ;;  %v7561_v3 = vadd.f32 %v4325_v33, %v4285_v34  ;;  %v4287_v38 = vadd.f32 %v4286_v9, %v7366_v19  ;;  %4688 = vmatprep.mubr.bf16.mxu0 %v6935_v40  ;;  %v6110_v40 = vld [vmem:[%s7761_s3 + $0x728] ss:$12 sps:$4 sm:$0xff]   ;;  %v6151_v31 = vld [vmem:[%s7761_s3 + $0xb78] ss:$12 sps:$4 sm:$0xff]   ;;  %v6154_v34 = vld [vmem:[%s7761_s3 + $0x9e0] ss:$12 sps:$4 sm:$0xff]  }
 0x2b2   : > { %4728 = vmatprep.mubr.bf16.mxu1 %v6937_v41  ;;  %v4288_v43 = vpop.f32.mrf.mxu0  ;;  %v6111_v41 = vld [vmem:[%s7761_s3 + $0x8a8] ss:$12 sps:$4 sm:$0xff]   ;;  %v6153_v33 = vld [vmem:[%s7761_s3 + $0xab8] ss:$12 sps:$4 sm:$0xff]   ;;  %v6157_v9 = vld [vmem:[%s7761_s3 + $0xaa0] ss:$12 sps:$4 sm:$0xff]  }
 0x2b3   : > { %v4329_v24 = vpop.f32.mrf.mxu1  ;;  %v7566_v39 = vadd.f32 %v4327_v49, %v4287_v38  ;;  %5522 = vmatpush3.bf16.msra.mxu0 %v6104_v55  ;;  %v6155_v55 = vld [vmem:[%s7761_s3 + $0xb60] ss:$12 sps:$4 sm:$0xff]   ;;  %v6158_v49 = vld [vmem:[%s7761_s3 + $0x9c8] ss:$12 sps:$4 sm:$0xff]  }
 0x2b4   : > { %5544 = vmatpush3.bf16.msra.mxu1 %v6105_v37  ;;  %v4289_v46 = vpop.f32.mrf.mxu0  ;;  %5523 = vmatprep.subr.bf16.mxu0 %v6106_v12  ;;  %v6156_v37 = vld [vmem:[%s7761_s3 + $0x920] ss:$12 sps:$4 sm:$0xff]   ;;  %v6159_v12 = vld [vmem:[%s7761_s3 + $0xb48] ss:$12 sps:$4 sm:$0xff]  }
 0x2b5   : > { %v4330_v19 = vpop.f32.mrf.mxu1  ;;  %5545 = vmatprep.subr.bf16.mxu1 %v6107_v14  ;;  %v6160_v14 = vld [vmem:[%s7761_s3 + $0x908] ss:$12 sps:$4 sm:$0xff]  }
 0x2b6   : > { %v6161_v38 = vld [vmem:[%s7761_s3 + $0xa88] ss:$12 sps:$4 sm:$0xff]  }
 0x2b7   : > { %5524 = vmatpush3.bf16.msra.mxu0 %v6108_v42 }
 0x2b8   : > { %5546 = vmatpush3.bf16.msra.mxu1 %v6109_v45  ;;  %5525 = vmatprep.subr.bf16.mxu0 %v6110_v40 }
 0x2b9   : > { %5547 = vmatprep.subr.bf16.mxu1 %v6111_v41 }
 0x2bb   : > { %5526 = vmatpush3.bf16.msra.mxu0 %v6112_v47 }
 0x2bc   : > { %5548 = vmatpush3.bf16.msra.mxu1 %v6113_v48  ;;  %5527 = vmatprep.subr.bf16.mxu0 %v6114_v50 }
 0x2bd   : > { %5549 = vmatprep.subr.bf16.mxu1 %v6115_v56 }
 0x2bf   : > { %5528 = vmatpush3.bf16.msra.mxu0 %v6116_v57 }
 0x2c0   : > { %5550 = vmatpush3.bf16.msra.mxu1 %v6117_v60  ;;  %5529 = vmatprep.subr.bf16.mxu0 %v6118_v61 }
 0x2c1   : > { %5551 = vmatprep.subr.bf16.mxu1 %v6119_v53 }
 0x2c3   : > { %5530 = vmatpush3.bf16.msra.mxu0 %v6120_v35 }
 0x2c4   : > { %5552 = vmatpush3.bf16.msra.mxu1 %v6121_v36  ;;  %5531 = vmatprep.subr.bf16.mxu0 %v6122_v58 }
 0x2c5   : > { %5553 = vmatprep.subr.bf16.mxu1 %v6123_v62 }
 0x2c7   : > { %5532 = vmatpush3.bf16.msra.mxu0 %v6124_v22 }
 0x2c8   : > { %5554 = vmatpush3.bf16.msra.mxu1 %v6125_v23  ;;  %5533 = vmatprep.subr.bf16.mxu0 %v6126_v63 }
 0x2c9   : > { %5555 = vmatprep.subr.bf16.mxu1 %v6127_v5 }
 0x2cb   : > { %5534 = vmatpush3.bf16.msra.mxu0 %v6128_v59 }
 0x2cc   : > { %5556 = vmatpush3.bf16.msra.mxu1 %v6129_v54  ;;  %5563 = vmatprep.subr.bf16.mxu0 %v6130_v0 }
 0x2cd   : > { %5585 = vmatprep.subr.bf16.mxu1 %v6131_v1 }
 0x2ce   : > { %4689 = vmatmul.mubr.bf16.vlgmr.msra.gmra.mxu0 %v7110_v8  ;;  %v6139_v8 = vld [vmem:[%s7761_s3 + $0xbc0] ss:$12 sps:$4 sm:$0xff]  }
 0x2cf   : > { %4729 = vmatmul.mubr.bf16.vlgmr.msra.gmra.mxu1 %v7112_v10  ;;  %5564 = vmatpush3.bf16.msra.mxu0 %v6132_v2  ;;  %v6140_v10 = vld [vmem:[%s7761_s3 + $0x980] ss:$12 sps:$4 sm:$0xff]  }
 0x2d0   : > { %5586 = vmatpush3.bf16.msra.mxu1 %v6133_v4  ;;  %5565 = vmatprep.subr.bf16.mxu0 %v6134_v7 }
 0x2d1   : > { %5587 = vmatprep.subr.bf16.mxu1 %v6135_v11  ;;  %4768 = vmatprep.mubr.bf16.mxu0 %v7126_v20  ;;  %v6143_v20 = vld [vmem:[%s7761_s3 + $0xba8] ss:$12 sps:$4 sm:$0xff]  }
 0x2d2   : > { %4808 = vmatprep.mubr.bf16.mxu1 %v7128_v21  ;;  %v6144_v21 = vld [vmem:[%s7761_s3 + $0x968] ss:$12 sps:$4 sm:$0xff]  }
 0x2d3   : > { %5566 = vmatpush3.bf16.msra.mxu0 %v6136_v17 }
 0x2d4   : > { %5588 = vmatpush3.bf16.msra.mxu1 %v6137_v18  ;;  %5567 = vmatprep.subr.bf16.mxu0 %v6138_v13 }
 0x2d5   : > { %5589 = vmatprep.subr.bf16.mxu1 %v6139_v8 }
 0x2d7   : > { %5568 = vmatpush3.bf16.msra.mxu0 %v6140_v10 }
 0x2d8   : > { %5590 = vmatpush3.bf16.msra.mxu1 %v6141_v25  ;;  %5569 = vmatprep.subr.bf16.mxu0 %v6142_v26 }
 0x2d9   : > { %5591 = vmatprep.subr.bf16.mxu1 %v6143_v20 }
 0x2db   : > { %5570 = vmatpush3.bf16.msra.mxu0 %v6144_v21 }
 0x2dc   : > { %5592 = vmatpush3.bf16.msra.mxu1 %v6145_v15  ;;  %5571 = vmatprep.subr.bf16.mxu0 %v6146_v16 }
 0x2dd   : > { %5593 = vmatprep.subr.bf16.mxu1 %v6147_v27 }
 0x2df   : > { %5572 = vmatpush3.bf16.msra.mxu0 %v6148_v28 }
 0x2e0   : > { %5594 = vmatpush3.bf16.msra.mxu1 %v6149_v29  ;;  %5573 = vmatprep.subr.bf16.mxu0 %v6150_v30 }
 0x2e1   : > { %5595 = vmatprep.subr.bf16.mxu1 %v6151_v31 }
 0x2e3   : > { %5574 = vmatpush3.bf16.msra.mxu0 %v6152_v32 }
 0x2e4   : > { %5596 = vmatpush3.bf16.msra.mxu1 %v6153_v33  ;;  %5575 = vmatprep.subr.bf16.mxu0 %v6154_v34 }
 0x2e5   : > { %5597 = vmatprep.subr.bf16.mxu1 %v6155_v55 }
 0x2e7   : > { %5576 = vmatpush3.bf16.msra.mxu0 %v6156_v37 }
 0x2e8   : > { %5598 = vmatpush3.bf16.msra.mxu1 %v6157_v9  ;;  %5577 = vmatprep.subr.bf16.mxu0 %v6158_v49 }
 0x2e9   : > { %5599 = vmatprep.subr.bf16.mxu1 %v6159_v12 }
 0x2eb   : > { %5578 = vmatpush3.bf16.msra.mxu0 %v6160_v14 }
 0x2ec   : > { %5600 = vmatpush3.bf16.msra.mxu1 %v6161_v38 }
 0x2ee   : > { %v4366_v43 = vpop.f32.mrf.mxu0  ;;  %4769 = vmatmul.mubr.bf16.vlgmr.msra.gmra.mxu0 %v7325_v51 }
 0x2ef   : > { %v4407_v24 = vpop.f32.mrf.mxu1  ;;  %4809 = vmatmul.mubr.bf16.vlgmr.msra.gmra.mxu1 %v7327_v52  ;;  %v4367_v47 = vadd.f32 %v4366_v43, %v7561_v3 }
 0x2f0   : > { %v4368_v42 = vpop.f32.mrf.mxu0 }
 0x2f1   : > { %v4409_v45 = vpop.f32.mrf.mxu1  ;;  %v4369_v48 = vadd.f32 %v4368_v42, %v7566_v39  ;;  %v4408_v50 = vadd.f32 %v4407_v24, %v4367_v47  ;;  %v2116_v39 = vrot.slane %v7314_v44, %v6606_v6 }
 0x2f2   : > { %v4370_v46 = vpop.f32.mrf.mxu0 }
 0x2f3   : > { %v4411_v19 = vpop.f32.mrf.mxu1  ;;  %v4410_v60 = vadd.f32 %v4409_v45, %v4369_v48 }
 0x2f4   : > { %v4371_v40 = vpop.f32.mrf.mxu0 }
 0x2f5   : > { %v4412_v41 = vpop.f32.mrf.mxu1 }
 0x32e   : > { %v4448_v56 = vpop.f32.mrf.mxu0 }
 0x32f   : > { %v4489_v57 = vpop.f32.mrf.mxu1  ;;  %v4449_v61 = vadd.f32 %v4448_v56, %v4408_v50 }
 0x330   : > { %v4450_v51 = vpop.f32.mrf.mxu0 }
 0x331   : > { %v4491_v53 = vpop.f32.mrf.mxu1  ;;  %v4490_v52 = vadd.f32 %v4489_v57, %v4449_v61  ;;  %v4451_v35 = vadd.f32 %v4450_v51, %v4410_v60 }
 0x332   : > { %v4452_v36 = vpop.f32.mrf.mxu0 }
 0x333   : > { %v4493_v58 = vpop.f32.mrf.mxu1  ;;  %4816 = vst [vmem:[%s6277_s11] sm:$0xff] %v4490_v52  ;;  %v4492_v62 = vadd.f32 %v4491_v53, %v4451_v35 }
 0x334   : > { %v4453_v22 = vpop.f32.mrf.mxu0 }
 0x335   : > { %v4494_v23 = vpop.f32.mrf.mxu1  ;;  %4817 = vst [vmem:[%s6277_s11 + $0x8] sm:$0xff] %v4492_v62 }
 0x34e   : > { %v5447_v3 = vpop.f32.mrf.mxu0 }
 0x34f   : > { %v5469_v63 = vpop.f32.mrf.mxu1 }
 0x350   : > { %v5448_v5 = vpop.f32.mrf.mxu0 }
 0x351   : > { %v5470_v59 = vpop.f32.mrf.mxu1  ;;  %v5449_v54 = vadd.f32 %v5448_v5, %v5447_v3 }
 0x352   : > { %v5471_v0 = vadd.f32 %v5470_v59, %v5469_v63  ;;  %v5450_v1 = vpop.f32.mrf.mxu0 }
 0x353   : > { %v5472_v2 = vpop.f32.mrf.mxu1  ;;  %v4531_v4 = vadd.f32 %v5449_v54, %v2116_v39 }
 0x354   : > { %v5451_v7 = vpop.f32.mrf.mxu0 }
 0x355   : > { %v5473_v11 = vpop.f32.mrf.mxu1  ;;  %v4571_v17 = vadd.f32 %v5471_v0, %v4531_v4 }
 0x36e   : > { %v5491_v18 = vpop.f32.mrf.mxu0 }
 0x36f   : > { %v5513_v13 = vpop.f32.mrf.mxu1 }
 0x370   : > { %v5492_v8 = vpop.f32.mrf.mxu0 }
 0x371   : > { %v5514_v10 = vpop.f32.mrf.mxu1  ;;  %v5493_v31 = vadd.f32 %v5492_v8, %v5491_v18 }
 0x372   : > { %v5494_v25 = vpop.f32.mrf.mxu0  ;;  %v5515_v33 = vadd.f32 %v5514_v10, %v5513_v13 }
 0x373   : > { %v5516_v26 = vpop.f32.mrf.mxu1  ;;  %v4611_v32 = vadd.f32 %v5493_v31, %v4571_v17 }
 0x374   : > { %v5495_v20 = vpop.f32.mrf.mxu0 }
 0x375   : > { %v5517_v21 = vpop.f32.mrf.mxu1  ;;  %v4651_v55 = vadd.f32 %v5515_v33, %v4611_v32 }
 0x38e   : > { %v5535_v15 = vpop.f32.mrf.mxu0 }
 0x38f   : > { %v5557_v6 = vpop.f32.mrf.mxu1 }
 0x390   : > { %v5536_v44 = vpop.f32.mrf.mxu0 }
 0x391   : > { %v5558_v16 = vpop.f32.mrf.mxu1  ;;  %v5537_v34 = vadd.f32 %v5536_v44, %v5535_v15 }
 0x392   : > { %v5538_v27 = vpop.f32.mrf.mxu0  ;;  %v5559_v9 = vadd.f32 %v5558_v16, %v5557_v6 }
 0x393   : > { %v5560_v28 = vpop.f32.mrf.mxu1  ;;  %v4691_v37 = vadd.f32 %v5537_v34, %v4651_v55 }
 0x394   : > { %v5539_v29 = vpop.f32.mrf.mxu0 }
 0x395   : > { %v5561_v30 = vpop.f32.mrf.mxu1  ;;  %v4731_v43 = vadd.f32 %v5559_v9, %v4691_v37 }
 0x3ae   : > { %v5579_v49 = vpop.f32.mrf.mxu0 }
 0x3af   : > { %v5601_v12 = vpop.f32.mrf.mxu1 }
 0x3b0   : > { %v5580_v14 = vpop.f32.mrf.mxu0 }
 0x3b1   : > { %v5602_v38 = vpop.f32.mrf.mxu1  ;;  %v5581_v24 = vadd.f32 %v5580_v14, %v5579_v49 }
 0x3b2   : > { %v5582_v42 = vpop.f32.mrf.mxu0  ;;  %v5603_v19 = vadd.f32 %v5602_v38, %v5601_v12 }
 0x3b3   : > { %v5604_v45 = vpop.f32.mrf.mxu1  ;;  %v4771_v46 = vadd.f32 %v5581_v24, %v4731_v43 }
 0x3b4   : > { %v5583_v40 = vpop.f32.mrf.mxu0 }
 0x3b5   : > { %v5605_v41 = vpop.f32.mrf.mxu1  ;;  %v4811_v47 = vadd.f32 %v5603_v19, %v4771_v46 }
 0x3b7   : > { %4818 = vst [vmem:[%s6277_s11 + $0x10] sm:$0xff] %v4811_v47 }
 0x3b8 PF: > { %s15_s22 = sadd.s32 1, %s6200_s22   ;;  %s7764_s18 = smov %s6192_s20 }
 0x3b9   : > { %p12_p10 = scmp.ge.s32.totalorder %s15_s22, 6   ;;  %s7765_s19 = smov %s6196_s21 }
 0x3ba   : > { %s7766_s20 = smov %s7769_s23  ;;  %s7767_s21 = smov %s7773_s24 }
 0x3bb   :  { %14 = sbr.rel (!%p12_p10) target bundleno = 3 (0x3), region = 81 }

</bundles_post_ra>
